<compile_context>
chip_gen: v6e
topology: v6e:2x2x1
jax: 0.10.0
libtpu: 0.0.40
codegen_flags: <defaults>
</compile_context>

<pallas_src>
import functools

import jax
import jax.numpy as jnp
from jax.experimental import pallas as pl
from jax.experimental.pallas import tpu as pltpu

_LANE = 128


def _round_up(v, m):
    return (v + m - 1) // m * m


def _fae_kernel(basis_dim, e_pad,
                x_ref,
                w1_ref, b1_ref, w2_ref, b2_ref,
                w3_ref, b3_ref, w4_ref, b4_ref,
                wrow_ref,
                out_ref, enc_ref):
    f32 = jnp.float32
    mm_dtype = w1_ref.dtype                      # matmul operand dtype (f32 or bf16)

    x = x_ref[...]                               # (TN, D)

    # --- encoder: Linear -> ReLU -> (Dropout == identity at eval) -> Linear ---
    h1 = jnp.maximum(
        jnp.dot(x, w1_ref[...], preferred_element_type=f32) + b1_ref[...], 0.0)
    enc = jnp.dot(h1.astype(mm_dtype), w2_ref[...],
                  preferred_element_type=f32) + b2_ref[...]          # (TN, Bn_pad)
    enc_ref[...] = enc

    # --- decoder: Linear -> ReLU -> (Dropout) -> Linear (basis folded into W4/b4) ---
    h2 = jnp.maximum(
        jnp.dot(enc.astype(mm_dtype), w3_ref[...],
                preferred_element_type=f32) + b3_ref[...], 0.0)
    dec = jnp.dot(h2.astype(mm_dtype), w4_ref[...],
                  preferred_element_type=f32) + b4_ref[...]          # (TN, K*E_pad)

    # --- relu, per-k scalar weight (pre-broadcast lane row), sum over K ---
    wdec = jnp.maximum(dec, 0.0) * wrow_ref[...]
    acc = wdec[:, 0:e_pad]                       # init from k=0 term (no zero-fill)
    for k in range(1, basis_dim):                # K is small & static; lane-aligned slices
        acc = acc + wdec[:, k * e_pad:(k + 1) * e_pad]
    out_ref[...] = acc


def functional_autoencoder_forward(x, params, basis_eval_t, weights_flat, basis_dim,
                                   *, block_n=256, matmul_dtype=jnp.float32):
    """x: (N, D) float32.  basis_eval_t: (D, E) == torch .t() of the supplied basis.
    weights_flat: (K,) or (K,1) float32.  Linear weights stored as (in, out)."""
    N, D = x.shape
    H = params["w1"].shape[1]
    Bn = params["w2"].shape[1]
    E = basis_eval_t.shape[1]
    K = basis_dim
    f32 = jnp.float32

    e_pad = _round_up(E, _LANE)
    bn_pad = _round_up(Bn, _LANE)

    # ---- parameter prep (done in f32, matmul operands cast afterwards) ----
    basis_p = jnp.zeros((D, e_pad), f32).at[:, :E].set(basis_eval_t.astype(f32))

    w1 = params["w1"].astype(f32)
    b1 = params["b1"].astype(f32).reshape(1, H)

    w2 = jnp.zeros((H, bn_pad), f32).at[:, :Bn].set(params["w2"].astype(f32))
    b2 = jnp.zeros((1, bn_pad), f32).at[:, :Bn].set(
        params["b2"].astype(f32).reshape(1, Bn))

    w3 = jnp.zeros((bn_pad, H), f32).at[:Bn, :].set(params["w3"].astype(f32))
    b3 = params["b3"].astype(f32).reshape(1, H)

    # Fold the basis into the last linear layer (exact up to float reassociation):
    # (h2 @ W4 + b4).reshape(N,K,D) @ B  ==  h2 @ W4' + b4'
    w4p = jnp.einsum("hkd,de->hke",
                     params["w4"].astype(f32).reshape(H, K, D),
                     basis_p).reshape(H, K * e_pad)
    b4p = (params["b4"].astype(f32).reshape(K, D) @ basis_p).reshape(1, K * e_pad)

    wrow = jnp.repeat(weights_flat.astype(f32).reshape(K, 1),
                      e_pad, axis=1).reshape(1, K * e_pad)

    # matmul operand dtype (bf16 halves HBM/VMEM bytes; accumulation stays f32)
    xc = x.astype(matmul_dtype)
    w1c, w2c, w3c, w4c = (w.astype(matmul_dtype) for w in (w1, w2, w3, w4p))

    # ---- batch tiling ----
    tn = _round_up(min(block_n, _round_up(N, 16)), 16)
    n_pad = _round_up(N, tn)
    if n_pad != N:
        xc = jnp.zeros((n_pad, D), matmul_dtype).at[:N, :].set(xc)
    grid = (n_pad // tn,)

    # ---- VMEM budget estimate (per grid step, double-buffered I/O + resident weights) ----
    itm = jnp.dtype(matmul_dtype).itemsize
    per_step = (2 * tn * D * itm                                    # x tiles
                + 2 * tn * (e_pad + bn_pad) * 4                     # output tiles
                + (D * H + H * bn_pad + bn_pad * H + H * K * e_pad) * itm   # resident weights
                + (2 * H + bn_pad + 2 * K * e_pad) * 4              # biases + weight row
                + tn * (2 * H + bn_pad + K * e_pad) * 4)            # intermediates
    vmem_limit = int(min(max(2 * per_step, 16 * 1024 * 1024), 48 * 1024 * 1024))

    def _const(shape):
        return pl.BlockSpec(shape, lambda i: (0, 0))

    in_specs = [
        pl.BlockSpec((tn, D), lambda i: (i, 0)),          # x tile
        _const((D, H)), _const((1, H)),                   # w1, b1
        _const((H, bn_pad)), _const((1, bn_pad)),         # w2, b2 (lane-padded)
        _const((bn_pad, H)), _const((1, H)),              # w3, b3
        _const((H, K * e_pad)), _const((1, K * e_pad)),   # w4', b4' (basis folded in)
        _const((1, K * e_pad)),                           # per-k weights, broadcast row
    ]
    out_specs = (
        pl.BlockSpec((tn, e_pad), lambda i: (i, 0)),
        pl.BlockSpec((tn, bn_pad), lambda i: (i, 0)),
    )

    kernel = functools.partial(_fae_kernel, K, e_pad)
    out_pad, enc_pad = pl.pallas_call(
        kernel,
        grid=grid,
        in_specs=in_specs,
        out_specs=out_specs,
        out_shape=(jax.ShapeDtypeStruct((n_pad, e_pad), f32),
                   jax.ShapeDtypeStruct((n_pad, bn_pad), f32)),
        compiler_params=pltpu.CompilerParams(
            dimension_semantics=("parallel",),
            vmem_limit_bytes=vmem_limit),
    )(xc, w1c, b1, w2c, b2, w3c, b3, w4c, b4p, wrow)

    return out_pad[:N, :E], enc_pad[:N, :Bn]


def _reference_forward(x, params, basis_eval_t, weights_flat, basis_dim):
    """Pure-JAX reference mirroring the PyTorch module (eval mode)."""
    D = x.shape[1]
    h1 = jax.nn.relu(x @ params["w1"] + params["b1"])
    enc = h1 @ params["w2"] + params["b2"]
    h2 = jax.nn.relu(enc @ params["w3"] + params["b3"])
    dec = h2 @ params["w4"] + params["b4"]
    dec = dec.reshape(-1, basis_dim, D)
    basis_out = jnp.matmul(dec, basis_eval_t)
    act = jax.nn.relu(basis_out)
    out = jnp.sum(act * weights_flat.reshape(1, basis_dim, 1), axis=1)
    return out, enc


if __name__ == "__main__":
    # Small shapes consistent with the module's __init__ (batch chosen to exercise the grid
    # and the row-padding path: N=200 -> 2 grid steps of 128 rows).
    N = 200           # batch
    D = 16            # input_size
    H = 32            # hidden_size
    Bn = 8            # bottleneck_size
    K = 4             # basis_dim
    E = 16            # number of basis evaluation points

    key = jax.random.PRNGKey(0)
    ks = jax.random.split(key, 12)

    def init_linear(kw, kb, fan_in, fan_out):
        # weights stored as (in, out) so the kernel computes y = x @ W + b
        w = jax.random.normal(kw, (fan_in, fan_out), jnp.float32) * 0.1
        b = jax.random.normal(kb, (1, fan_out), jnp.float32) * 0.1
        return w, b

    w1, b1 = init_linear(ks[0], ks[1], D, H)
    w2, b2 = init_linear(ks[2], ks[3], H, Bn)
    w3, b3 = init_linear(ks[4], ks[5], Bn, H)
    w4, b4 = init_linear(ks[6], ks[7], H, D * K)
    params = {"w1": w1, "b1": b1, "w2": w2, "b2": b2,
              "w3": w3, "b3": b3, "w4": w4, "b4": b4}

    # basis_eval passed to __init__ as (E, D); the module stores its transpose (D, E).
    basis_eval = jax.random.normal(ks[8], (E, D), jnp.float32)
    basis_eval_t = basis_eval.T

    # Module inits self.weights to zeros((K,1)); use small random values so the weighted-sum
    # path is exercised (same shape semantics).
    weights_flat = jax.random.normal(ks[9], (K,), jnp.float32) * 0.5

    x = jax.random.normal(ks[10], (N, D), jnp.float32)

    ref_out, ref_enc = _reference_forward(x, params, basis_eval_t, weights_flat, K)

    # f32 matmul operands: tight tolerance (only float reassociation from the basis fold).
    out, enc = functional_autoencoder_forward(x, params, basis_eval_t, weights_flat, K,
                                              block_n=128)
    jax.block_until_ready((out, enc))
    assert out.shape == (N, E) and enc.shape == (N, Bn)
    assert jnp.allclose(out, ref_out, atol=1e-4, rtol=1e-4)
    assert jnp.allclose(enc, ref_enc, atol=1e-4, rtol=1e-4)

    # bf16 matmul operands (bandwidth/MXU-rate lever on v5e/v6e; f32 accumulation): loose check.
    out_bf, enc_bf = functional_autoencoder_forward(x, params, basis_eval_t, weights_flat, K,
                                                    block_n=128, matmul_dtype=jnp.bfloat16)
    jax.block_until_ready((out_bf, enc_bf))
    assert jnp.allclose(out_bf, ref_out, atol=1e-1, rtol=1e-1)
    assert jnp.allclose(enc_bf, ref_enc, atol=1e-1, rtol=1e-1)

    print("KERNEL_OK")
</pallas_src>

<mosaic_0001>
module attributes {stable_mosaic.version = 11 : i64} {
  func.func @_fae_kernel(%arg0: i32, %arg1: memref<128x16xf32, #tpu.memory_space<vmem>>, %arg2: memref<16x32xf32, #tpu.memory_space<vmem>>, %arg3: memref<1x32xf32, #tpu.memory_space<vmem>>, %arg4: memref<32x128xf32, #tpu.memory_space<vmem>>, %arg5: memref<1x128xf32, #tpu.memory_space<vmem>>, %arg6: memref<128x32xf32, #tpu.memory_space<vmem>>, %arg7: memref<1x32xf32, #tpu.memory_space<vmem>>, %arg8: memref<32x512xf32, #tpu.memory_space<vmem>>, %arg9: memref<1x512xf32, #tpu.memory_space<vmem>>, %arg10: memref<1x512xf32, #tpu.memory_space<vmem>>, %arg11: memref<128x128xf32, #tpu.memory_space<vmem>>, %arg12: memref<128x128xf32, #tpu.memory_space<vmem>>) attributes {dimension_semantics = [#tpu.dimension_semantics<parallel>], iteration_bounds = array<i64: 2>, scalar_prefetch = 0 : i64, scratch_operands = 0 : i64, tpu.core_type = #tpu.core_type<tc>, window_params = [{transform_indices = @transform_0, window_bounds = array<i64: 128, 16>}, {pipeline_mode = #tpu.pipeline_mode<synchronous>, transform_indices = @transform_1, window_bounds = array<i64: 16, 32>}, {pipeline_mode = #tpu.pipeline_mode<synchronous>, transform_indices = @transform_2, window_bounds = array<i64: 1, 32>}, {pipeline_mode = #tpu.pipeline_mode<synchronous>, transform_indices = @transform_3, window_bounds = array<i64: 32, 128>}, {pipeline_mode = #tpu.pipeline_mode<synchronous>, transform_indices = @transform_4, window_bounds = array<i64: 1, 128>}, {pipeline_mode = #tpu.pipeline_mode<synchronous>, transform_indices = @transform_5, window_bounds = array<i64: 128, 32>}, {pipeline_mode = #tpu.pipeline_mode<synchronous>, transform_indices = @transform_6, window_bounds = array<i64: 1, 32>}, {pipeline_mode = #tpu.pipeline_mode<synchronous>, transform_indices = @transform_7, window_bounds = array<i64: 32, 512>}, {pipeline_mode = #tpu.pipeline_mode<synchronous>, transform_indices = @transform_8, window_bounds = array<i64: 1, 512>}, {pipeline_mode = #tpu.pipeline_mode<synchronous>, transform_indices = @transform_9, window_bounds = array<i64: 1, 512>}, {transform_indices = @transform_10, window_bounds = array<i64: 128, 128>}, {transform_indices = @transform_11, window_bounds = array<i64: 128, 128>}]} {
    %c0 = arith.constant 0 : index
    %c0_0 = arith.constant 0 : index
    %0 = vector.load %arg1[%c0, %c0_0] : memref<128x16xf32, #tpu.memory_space<vmem>>, vector<128x16xf32>
    %c0_1 = arith.constant 0 : index
    %c0_2 = arith.constant 0 : index
    %1 = vector.load %arg2[%c0_1, %c0_2] : memref<16x32xf32, #tpu.memory_space<vmem>>, vector<16x32xf32>
    %cst = arith.constant dense<0.000000e+00> : vector<128x32xf32>
    %2 = tpu.matmul %0, %1, %cst {dimension_numbers = #tpu.dot_dimension_numbers<[1], [0], [0], [1], [0, 0, 1, 1], [], []>} : vector<128x16xf32>, vector<16x32xf32>, vector<128x32xf32> -> vector<128x32xf32>
    %c0_3 = arith.constant 0 : index
    %c0_4 = arith.constant 0 : index
    %3 = vector.load %arg3[%c0_3, %c0_4] : memref<1x32xf32, #tpu.memory_space<vmem>>, vector<1x32xf32>
    %4 = vector.broadcast %3 : vector<1x32xf32> to vector<128x32xf32>
    %5 = arith.addf %2, %4 : vector<128x32xf32>
    %cst_5 = arith.constant 0.000000e+00 : f32
    %6 = vector.broadcast %cst_5 : f32 to vector<128x32xf32>
    %7 = arith.maximumf %5, %6 : vector<128x32xf32>
    %c0_6 = arith.constant 0 : index
    %c0_7 = arith.constant 0 : index
    %8 = vector.load %arg4[%c0_6, %c0_7] : memref<32x128xf32, #tpu.memory_space<vmem>>, vector<32x128xf32>
    %cst_8 = arith.constant dense<0.000000e+00> : vector<128x128xf32>
    %9 = tpu.matmul %7, %8, %cst_8 {dimension_numbers = #tpu.dot_dimension_numbers<[1], [0], [0], [1], [0, 0, 1, 1], [], []>} : vector<128x32xf32>, vector<32x128xf32>, vector<128x128xf32> -> vector<128x128xf32>
    %c0_9 = arith.constant 0 : index
    %c0_10 = arith.constant 0 : index
    %10 = vector.load %arg5[%c0_9, %c0_10] : memref<1x128xf32, #tpu.memory_space<vmem>>, vector<1x128xf32>
    %11 = vector.broadcast %10 : vector<1x128xf32> to vector<128x128xf32>
    %12 = arith.addf %9, %11 : vector<128x128xf32>
    %c0_11 = arith.constant 0 : index
    %c0_12 = arith.constant 0 : index
    %13 = vector.load %arg12[%c0_11, %c0_12] : memref<128x128xf32, #tpu.memory_space<vmem>>, vector<128x128xf32>
    tpu.vector_store %arg12[%c0_11, %c0_12], %12 {strides = array<i32>} : memref<128x128xf32, #tpu.memory_space<vmem>>, vector<128x128xf32>,
    %c0_13 = arith.constant 0 : index
    %c0_14 = arith.constant 0 : index
    %14 = vector.load %arg6[%c0_13, %c0_14] : memref<128x32xf32, #tpu.memory_space<vmem>>, vector<128x32xf32>
    %cst_15 = arith.constant dense<0.000000e+00> : vector<128x32xf32>
    %15 = tpu.matmul %12, %14, %cst_15 {dimension_numbers = #tpu.dot_dimension_numbers<[1], [0], [0], [1], [0, 0, 1, 1], [], []>} : vector<128x128xf32>, vector<128x32xf32>, vector<128x32xf32> -> vector<128x32xf32>
    %c0_16 = arith.constant 0 : index
    %c0_17 = arith.constant 0 : index
    %16 = vector.load %arg7[%c0_16, %c0_17] : memref<1x32xf32, #tpu.memory_space<vmem>>, vector<1x32xf32>
    %17 = vector.broadcast %16 : vector<1x32xf32> to vector<128x32xf32>
    %18 = arith.addf %15, %17 : vector<128x32xf32>
    %cst_18 = arith.constant 0.000000e+00 : f32
    %19 = vector.broadcast %cst_18 : f32 to vector<128x32xf32>
    %20 = arith.maximumf %18, %19 : vector<128x32xf32>
    %c0_19 = arith.constant 0 : index
    %c0_20 = arith.constant 0 : index
    %21 = vector.load %arg8[%c0_19, %c0_20] : memref<32x512xf32, #tpu.memory_space<vmem>>, vector<32x512xf32>
    %cst_21 = arith.constant dense<0.000000e+00> : vector<128x512xf32>
    %22 = tpu.matmul %20, %21, %cst_21 {dimension_numbers = #tpu.dot_dimension_numbers<[1], [0], [0], [1], [0, 0, 1, 1], [], []>} : vector<128x32xf32>, vector<32x512xf32>, vector<128x512xf32> -> vector<128x512xf32>
    %c0_22 = arith.constant 0 : index
    %c0_23 = arith.constant 0 : index
    %23 = vector.load %arg9[%c0_22, %c0_23] : memref<1x512xf32, #tpu.memory_space<vmem>>, vector<1x512xf32>
    %24 = vector.broadcast %23 : vector<1x512xf32> to vector<128x512xf32>
    %25 = arith.addf %22, %24 : vector<128x512xf32>
    %cst_24 = arith.constant 0.000000e+00 : f32
    %26 = vector.broadcast %cst_24 : f32 to vector<128x512xf32>
    %27 = arith.maximumf %25, %26 : vector<128x512xf32>
    %c0_25 = arith.constant 0 : index
    %c0_26 = arith.constant 0 : index
    %28 = vector.load %arg10[%c0_25, %c0_26] : memref<1x512xf32, #tpu.memory_space<vmem>>, vector<1x512xf32>
    %29 = vector.broadcast %28 : vector<1x512xf32> to vector<128x512xf32>
    %30 = arith.mulf %27, %29 : vector<128x512xf32>
    %31 = vector.extract_strided_slice %30 {offsets = [0, 0], sizes = [128, 128], strides = [1, 1]} : vector<128x512xf32> to vector<128x128xf32>
    %32 = vector.extract_strided_slice %30 {offsets = [0, 128], sizes = [128, 128], strides = [1, 1]} : vector<128x512xf32> to vector<128x128xf32>
    %33 = arith.addf %31, %32 : vector<128x128xf32>
    %34 = vector.extract_strided_slice %30 {offsets = [0, 256], sizes = [128, 128], strides = [1, 1]} : vector<128x512xf32> to vector<128x128xf32>
    %35 = arith.addf %33, %34 : vector<128x128xf32>
    %36 = vector.extract_strided_slice %30 {offsets = [0, 384], sizes = [128, 128], strides = [1, 1]} : vector<128x512xf32> to vector<128x128xf32>
    %37 = arith.addf %35, %36 : vector<128x128xf32>
    %c0_27 = arith.constant 0 : index
    %c0_28 = arith.constant 0 : index
    %38 = vector.load %arg11[%c0_27, %c0_28] : memref<128x128xf32, #tpu.memory_space<vmem>>, vector<128x128xf32>
    tpu.vector_store %arg11[%c0_27, %c0_28], %37 {strides = array<i32>} : memref<128x128xf32, #tpu.memory_space<vmem>>, vector<128x128xf32>,
    return
  }
  func.func @transform_0(%arg0: i32) -> (i32, i32) {
    %c0_i32 = arith.constant 0 : i32
    %c0_i32_0 = arith.constant 0 : i32
    return %arg0, %c0_i32 : i32, i32
  }
  func.func @transform_1(%arg0: i32) -> (i32, i32) {
    %c0_i32 = arith.constant 0 : i32
    %c0_i32_0 = arith.constant 0 : i32
    %c0_i32_1 = arith.constant 0 : i32
    return %c0_i32, %c0_i32_0 : i32, i32
  }
  func.func @transform_2(%arg0: i32) -> (i32, i32) {
    %c0_i32 = arith.constant 0 : i32
    %c0_i32_0 = arith.constant 0 : i32
    %c0_i32_1 = arith.constant 0 : i32
    return %c0_i32, %c0_i32_0 : i32, i32
  }
  func.func @transform_3(%arg0: i32) -> (i32, i32) {
    %c0_i32 = arith.constant 0 : i32
    %c0_i32_0 = arith.constant 0 : i32
    %c0_i32_1 = arith.constant 0 : i32
    return %c0_i32, %c0_i32_0 : i32, i32
  }
  func.func @transform_4(%arg0: i32) -> (i32, i32) {
    %c0_i32 = arith.constant 0 : i32
    %c0_i32_0 = arith.constant 0 : i32
    %c0_i32_1 = arith.constant 0 : i32
    return %c0_i32, %c0_i32_0 : i32, i32
  }
  func.func @transform_5(%arg0: i32) -> (i32, i32) {
    %c0_i32 = arith.constant 0 : i32
    %c0_i32_0 = arith.constant 0 : i32
    %c0_i32_1 = arith.constant 0 : i32
    return %c0_i32, %c0_i32_0 : i32, i32
  }
  func.func @transform_6(%arg0: i32) -> (i32, i32) {
    %c0_i32 = arith.constant 0 : i32
    %c0_i32_0 = arith.constant 0 : i32
    %c0_i32_1 = arith.constant 0 : i32
    return %c0_i32, %c0_i32_0 : i32, i32
  }
  func.func @transform_7(%arg0: i32) -> (i32, i32) {
    %c0_i32 = arith.constant 0 : i32
    %c0_i32_0 = arith.constant 0 : i32
    %c0_i32_1 = arith.constant 0 : i32
    return %c0_i32, %c0_i32_0 : i32, i32
  }
  func.func @transform_8(%arg0: i32) -> (i32, i32) {
    %c0_i32 = arith.constant 0 : i32
    %c0_i32_0 = arith.constant 0 : i32
    %c0_i32_1 = arith.constant 0 : i32
    return %c0_i32, %c0_i32_0 : i32, i32
  }
  func.func @transform_9(%arg0: i32) -> (i32, i32) {
    %c0_i32 = arith.constant 0 : i32
    %c0_i32_0 = arith.constant 0 : i32
    %c0_i32_1 = arith.constant 0 : i32
    return %c0_i32, %c0_i32_0 : i32, i32
  }
  func.func @transform_10(%arg0: i32) -> (i32, i32) {
    %c0_i32 = arith.constant 0 : i32
    %c0_i32_0 = arith.constant 0 : i32
    return %arg0, %c0_i32 : i32, i32
  }
  func.func @transform_11(%arg0: i32) -> (i32, i32) {
    %c0_i32 = arith.constant 0 : i32
    %c0_i32_0 = arith.constant 0 : i32
    return %arg0, %c0_i32 : i32, i32
  }
}

</mosaic_0001>

<bundles_post_ra>
// kernel: tpu_custom_call.1
= control target key start
LH: loop header
LB: loop body
LE: loop exit
PB: predicated region body
PF: predicated region fallthrough
CT: control target
= control target key end

     0   :  { %s3001_s0 = inlined_call_operand.vmem [shape: f32[256,16], index: 0, kind: input, shape index: {}]   ;;  %s3002_s1 = inlined_call_operand.vmem [shape: f32[16,32], index: 1, kind: input, shape index: {}]   ;;  %s3003_s2 = inlined_call_operand.vmem [shape: f32[1,32], index: 2, kind: input, shape index: {}]   ;;  %s3004_s3 = inlined_call_operand.vmem [shape: f32[32,128], index: 3, kind: input, shape index: {}]   ;;  %s3005_s4 = inlined_call_operand.vmem [shape: f32[1,128], index: 4, kind: input, shape index: {}]   ;;  %s3006_s5 = inlined_call_operand.vmem [shape: f32[128,32], index: 5, kind: input, shape index: {}]   ;;  %s3007_s6 = inlined_call_operand.vmem [shape: f32[1,32], index: 6, kind: input, shape index: {}]   ;;  %s3008_s7 = inlined_call_operand.vmem [shape: f32[32,512], index: 7, kind: input, shape index: {}]   ;;  %s3009_s8 = inlined_call_operand.vmem [shape: f32[1,512], index: 8, kind: input, shape index: {}]   ;;  %s3010_s9 = inlined_call_operand.vmem [shape: f32[1,512], index: 9, kind: input, shape index: {}]   ;;  %s3011_s10 = inlined_call_operand.hbm [shape: f32[256,128], index: 10, kind: output, shape index: {0}]   ;;  %s3012_s11 = inlined_call_operand.hbm [shape: f32[256,128], index: 11, kind: output, shape index: {1}]  }
   0x1   :  { %3016 = sst [smem:[#allocation8_spill]] %s3001_s0 }
   0x2   :  { %3017 = sst [smem:[#allocation9_spill]] %s3002_s1 }
   0x3   :  { %17 = vsyncpa [#allocation3], 0 }
   0x4   :  { %19 = vsyncpa [#allocation3 + $0x1], 0 }
   0x5   :  { %20 = vsyncpa [#allocation5], 0 }
   0x6   :  { %22 = vsyncpa [#allocation5 + $0x1], 0  ;;  %s2298_s17 = smov 0   ;;  %s2300_s18 = smov 0  }
   0x7   :  { %s2302_s19 = smov 0   ;;  %s2304_s20 = smov 0  }
   0x8 LB: > { %s2319_s21 = sadd.s32 4294967295, %s2231_s20   ;;  %s1791_s22 = sadd.s32 4294967294, %s2231_s20   ;;  %s2231_s20 = sphi %s2304_s20, %s3029_s20   ;;  %s2227_s19 = sphi %s2302_s19, %s3028_s19   ;;  %s2223_s18 = sphi %s2300_s18, %s3027_s18   ;;  %s2219_s17 = sphi %s2298_s17, %s3026_s17  }
   0x9   : > { %s2323_s23 = sadd.s32 1, %s2231_s20   ;;  %s250_s24 = sadd.s32 1, %s2227_s19 }
   0xa   : > { %s247_s25 = ssub.s32 %s2231_s20, %s2323_s23  ;;  %p260_p0 = scmp.ne.s32.totalorder %s2227_s19, %s2223_s18 }
   0xb   : > { %p248_p1 = scmp.eq.s32.totalorder %s247_s25, 0  ;;  %p261_p2 = scmp.eq.s32.totalorder %s2319_s21, 1 }
   0xc   : > { %p266_p3 = scmp.ne.s32.totalorder %s2223_s18, %s2219_s17  ;;  %p267_p4 = scmp.eq.s32.totalorder %s1791_s22, 1 }
   0xd   : > { %s2334_s26 = scalar_select %p248_p1, %s2227_s19, %s250_s24  }
   0xe   : > { %p2336_p5 = por %p261_p2, %p260_p0  ;;  %p2340_p6 = por %p267_p4, %p266_p3 }
   0xf   : > { %p1794_p7 = scmp.ge.s32.totalorder %s2231_s20, 1  ;;  %p347_p8 = scmp.lt.s32.totalorder %s2231_s20, 3 }
  0x11   : > { %p348_p9 = pnand %p1794_p7, %p347_p8 }
  0x12   : > { %s3020_s1 = sld [smem:[#allocation9_spill]] (!%p348_p9)  ;;  %s1797_s14 = sshll.u32 (!%p348_p9), %s2319_s21, 4 }
  0x13   : > { %351 = sbr.rel (%p348_p9) target bundleno = 907 (0x38b), region = 60  ;;  %p393_p10 = scmp.lt.s32.totalorder (!%p348_p9), %s1797_s14, 31 }
  0x14   : > { %s3021_s0 = sld [smem:[#allocation8_spill]] (!%p348_p9)  ;;  %s2234_s13 = smov (!%p348_p9), [#allocation4]  }
  0x18   : > { %v417_v0 = vld [vmem:[%s3020_s1 + $0x8] sm:$0xff]  ;;  %v416_v1 = vld [vmem:[%s3020_s1] sm:$0xff]  ;;  %s3031_s14 = smov (!%p393_p10, %s1797_s14), 31  ;;  %vm425_vm0 = vcmask 130048   ;;  %v638_v18 = vld [vmem:[%s3004_s3 + $0x18] sm:$0xff]  ;;  %vm646_vm1 = vcmask 261120  }
  0x19   : > { %1946 = vmatprep.subr.mxu0 %v417_v0  ;;  %s1798_s15 = sshll.u32 %s3031_s14, 3  ;;  %1974 = vmatprep.subr.mxu1 %v638_v18  ;;  %v637_v19 = vld [vmem:[%s3004_s3 + $0x10] sm:$0xff]  ;;  %v636_v20 = vld [vmem:[%s3004_s3 + $0x8] sm:$0xff]  ;;  %v635_v21 = vld [vmem:[%s3004_s3] sm:$0xff] }
  0x1a   : > { %1947 = vmatpush3.msra.mxu0 %v417_v0  ;;  %s2356_s24 = scalar_lea.vmem %s3021_s0, %s1798_s15  ;;  %1975 = vmatpush3.msra.mxu1 %v638_v18  ;;  %v871_v22 = vld [vmem:[%s3006_s5 + $0x78] sm:$0xff]  ;;  %v2408_v23 = vld [vmem:[%s3006_s5 + $0x70] sm:$0xff]  ;;  %v2413_v24 = vld [vmem:[%s3006_s5 + $0x68] sm:$0xff]  ;;  %s2572_s15 = sand.u32 1, %s2223_s18  }
  0x1b   : > { %1948 = vmatprep.subr.mxu0 %v416_v1  ;;  %v400_v2 = vld [vmem:[%s2356_s24] sm:$0xff]  ;;  %v401_v3 = vld [vmem:[%s2356_s24 + $0x8] sm:$0xff]  ;;  %v402_v4 = vld [vmem:[%s2356_s24 + $0x10] sm:$0xff]  ;;  %1976 = vmatprep.subr.mxu1 %v637_v19  ;;  %s3013_s16 = sshll.u32 %s2572_s15, 7  ;;  %s2145_s0 = sshll.u32 %s2234_s13, 4  ;;  %s2146_s0 = int_to_ptr.vmem [resolvable:$false] %s2145_s0 }
  0x1c   : > { %1949 = vmatpush3.msra.mxu0 %v416_v1  ;;  %1950 = vmatprep.mubr.msk.f32.mxu0 %vm425_vm0, %v400_v2  ;;  %v403_v5 = vld [vmem:[%s2356_s24 + $0x18] sm:$0xff]  ;;  %v404_v6 = vld [vmem:[%s2356_s24 + $0x20] sm:$0xff]  ;;  %v405_v7 = vld [vmem:[%s2356_s24 + $0x28] sm:$0xff]  ;;  %s2583_s25 = scalar_lea.vmem [#allocation4], %s3013_s16  ;;  %s3014_s16 = sshll.u32 %s2319_s21, 11 }
  0x1d   : > { %1951 = vmatmul.mubr.msk.f32.vlgmr.msra.gmra.mxu0 %vm425_vm0, %v401_v3  ;;  %v406_v8 = vld [vmem:[%s2356_s24 + $0x30] sm:$0xff]  ;;  %v407_v9 = vld [vmem:[%s2356_s24 + $0x38] sm:$0xff]  ;;  %v408_v10 = vld [vmem:[%s2356_s24 + $0x40] sm:$0xff]  ;;  %1977 = vmatpush3.msra.mxu1 %v637_v19  ;;  %s1697_s29 = sshll.u32 %s2583_s25, 4  ;;  %s2147_s1 = scalar_lea.vmem %s2146_s0, 4096  ;;  %s2752_s29 = int_to_ptr.vmem [resolvable:$true] %s1697_s29 }
  0x1e   : > { %1953 = vmatprep.mubr.msk.f32.mxu0 %vm425_vm0, %v402_v4  ;;  %v409_v11 = vld [vmem:[%s2356_s24 + $0x48] sm:$0xff]  ;;  %v410_v12 = vld [vmem:[%s2356_s24 + $0x50] sm:$0xff]  ;;  %v411_v13 = vld [vmem:[%s2356_s24 + $0x58] sm:$0xff]  ;;  %1978 = vmatprep.subr.mxu1 %v636_v20  ;;  %s2141_s12 = scalar_lea.vmem %s2752_s29, 2048  ;;  %p2148_p0 = scmp.lt.s32.totalorder %s2752_s29, %s2146_s0 }
  0x1f   : > { %v412_v14 = vld [vmem:[%s2356_s24 + $0x60] sm:$0xff]  ;;  %v413_v15 = vld [vmem:[%s2356_s24 + $0x68] sm:$0xff]  ;;  %v414_v16 = vld [vmem:[%s2356_s24 + $0x70] sm:$0xff]  ;;  %1979 = vmatpush3.msra.mxu1 %v636_v20  ;;  %2006 = vmatprep.subr.mxu0 %v871_v22  ;;  %p2142_p11 = scmp.ne.s32.totalorder %s2752_s29, %s2141_s12  ;;  %p2149_p1 = scmp.lt.s32.totalorder %s2147_s1, %s2141_s12 }
  0x20   : > { %v415_v17 = vld [vmem:[%s2356_s24 + $0x78] sm:$0xff]  ;;  %1980 = vmatprep.subr.mxu1 %v635_v21  ;;  %2007 = vmatpush3.msra.mxu0 %v871_v22  ;;  %v2420_v25 = vld [vmem:[%s3006_s5 + $0x60] sm:$0xff]  ;;  %v2434_v27 = vld [vmem:[%s3006_s5 + $0x50] sm:$0xff]  ;;  %s2749_s24 = scalar_lea.hbm %s3012_s11, %s3014_s16 }
  0x21   : > { %1954 = vmatmul.mubr.msk.f32.gmra.mxu0 %vm425_vm0, %v403_v5  ;;  %1981 = vmatpush3.msra.mxu1 %v635_v21  ;;  %v2427_v26 = vld [vmem:[%s3006_s5 + $0x58] sm:$0xff]  ;;  %v2441_v28 = vld [vmem:[%s3006_s5 + $0x48] sm:$0xff]  ;;  %v2448_v29 = vld [vmem:[%s3006_s5 + $0x40] sm:$0xff]  ;;  %p2143_p12 = pnand %p2142_p11, %p2336_p5  ;;  %p2150_p2 = por %p2149_p1, %p2148_p0 }
  0x22   : > { %1956 = vmatprep.mubr.msk.f32.mxu0 %vm425_vm0, %v404_v6  ;;  %2062 = vmatprep.subr.mxu1 %v871_v22  ;;  %v2455_v30 = vld [vmem:[%s3006_s5 + $0x38] sm:$0xff]  ;;  %v2462_v31 = vld [vmem:[%s3006_s5 + $0x30] sm:$0xff]  ;;  %v2469_v32 = vld [vmem:[%s3006_s5 + $0x28] sm:$0xff] }
  0x23   : > { %2008 = vmatprep.subr.mxu0 %v2408_v23  ;;  %v2476_v33 = vld [vmem:[%s3006_s5 + $0x20] sm:$0xff]  ;;  %v2483_v34 = vld [vmem:[%s3006_s5 + $0x18] sm:$0xff]  ;;  %v2490_v35 = vld [vmem:[%s3006_s5 + $0x10] sm:$0xff]  ;;  %p2144_p13 = pneg %p2143_p12 }
  0x24   : > { %2009 = vmatpush3.msra.mxu0 %v2408_v23  ;;  %v2499_v36 = vld [vmem:[%s3003_s2] ss:$0 sm:$0xff]  ;;  %v857_v21 = vld [vmem:[%s3006_s5 + $0x8] sm:$0xff] }
  0x25   : > { %1957 = vmatmul.mubr.msk.f32.gmra.mxu0 %vm425_vm0, %v405_v7  ;;  %2010 = vmatprep.subr.mxu0 %v2413_v24  ;;  %p2151_p3 = pnand %p2150_p2, %p2144_p13 }
  0x26   : > { %1959 = vmatprep.mubr.msk.f32.mxu0 %vm425_vm0, %v406_v8  ;;  %2011 = vmatpush3.msra.mxu0 %v2413_v24 }
  0x27   : > { %2012 = vmatprep.subr.mxu0 %v2420_v25 }
  0x28   : > { %2013 = vmatpush3.msra.mxu0 %v2420_v25 }
  0x29   : > { %1960 = vmatmul.mubr.msk.f32.gmra.mxu0 %vm425_vm0, %v407_v9  ;;  %2014 = vmatprep.subr.mxu0 %v2427_v26 }
  0x2a   : > { %1962 = vmatprep.mubr.msk.f32.mxu0 %vm425_vm0, %v408_v10  ;;  %2015 = vmatpush3.msra.mxu0 %v2427_v26 }
  0x2b   : > { %2016 = vmatprep.subr.mxu0 %v2434_v27 }
  0x2c   : > { %2017 = vmatpush3.msra.mxu0 %v2434_v27 }
  0x2d   : > { %1963 = vmatmul.mubr.msk.f32.gmra.mxu0 %vm425_vm0, %v409_v11  ;;  %2018 = vmatprep.subr.mxu0 %v2441_v28 }
  0x2e   : > { %1965 = vmatprep.mubr.msk.f32.mxu0 %vm425_vm0, %v410_v12  ;;  %2019 = vmatpush3.msra.mxu0 %v2441_v28 }
  0x2f   : > { %2020 = vmatprep.subr.mxu0 %v2448_v29 }
  0x30   : > { %2021 = vmatpush3.msra.mxu0 %v2448_v29 }
  0x31   : > { %1966 = vmatmul.mubr.msk.f32.gmra.mxu0 %vm425_vm0, %v411_v13  ;;  %2022 = vmatprep.subr.mxu0 %v2455_v30 }
  0x32   : > { %1968 = vmatprep.mubr.msk.f32.mxu0 %vm425_vm0, %v412_v14  ;;  %2023 = vmatpush3.msra.mxu0 %v2455_v30 }
  0x33   : > { %2024 = vmatprep.subr.mxu0 %v2462_v31 }
  0x34   : > { %2025 = vmatpush3.msra.mxu0 %v2462_v31 }
  0x35   : > { %1969 = vmatmul.mubr.msk.f32.gmra.mxu0 %vm425_vm0, %v413_v15  ;;  %2026 = vmatprep.subr.mxu0 %v2469_v32 }
  0x36   : > { %1971 = vmatprep.mubr.msk.f32.mxu0 %vm425_vm0, %v414_v16  ;;  %2027 = vmatpush3.msra.mxu0 %v2469_v32 }
  0x37   : > { %2028 = vmatprep.subr.mxu0 %v2476_v33 }
  0x38   : > { %2029 = vmatpush3.msra.mxu0 %v2476_v33 }
  0x39   : > { %1972 = vmatmul.mubr.msk.f32.gmra.mxu0 %vm425_vm0, %v415_v17  ;;  %2030 = vmatprep.subr.mxu0 %v2483_v34 }
  0x3a   : > { %2031 = vmatpush3.msra.mxu0 %v2483_v34 }
  0x3b   : > { %2032 = vmatprep.subr.mxu0 %v2490_v35 }
  0x3c   : > { %2033 = vmatpush3.msra.mxu0 %v2490_v35 }
  0x3d   : > { %2034 = vmatprep.subr.mxu0 %v857_v21 }
  0x3e   : > { %2035 = vmatpush3.msra.mxu0 %v857_v21 }
  0xdd   : > { %v1952_v37 = vpop.f32.mrf.mxu0 }
  0xde   : > { %v546_v38 = vadd.f32 %v1952_v37, %v2499_v36 }
  0xdf   : > { %v540_v39 = vpop.f32.mrf.mxu0 }
  0xe0   : > { %v541_v40 = vadd.f32 %v2499_v36, %v540_v39  ;;  %v620_v44 = vmax.f32 %v546_v38, 0.0 }
  0xe1   : > { %v1955_v41 = vpop.f32.mrf.mxu0 }
  0xe2   : > { %v619_v42 = vmax.f32 %v541_v40, 0.0  ;;  %v556_v43 = vadd.f32 %v1955_v41, %v2499_v36 }
  0xe3   : > { %v550_v45 = vpop.f32.mrf.mxu0 }
  0xe4   : > { %v551_v46 = vadd.f32 %v2499_v36, %v550_v45  ;;  %1982 = vmatprep.mubr.msk.f32.mxu1 %vm646_vm1, %v619_v42  ;;  %v622_v47 = vmax.f32 %v556_v43, 0.0 }
  0xe5   : > { %v1958_v48 = vpop.f32.mrf.mxu0  ;;  %1983 = vmatmul.mubr.msk.f32.vlgmr.msra.gmra.mxu1 %vm646_vm1, %v620_v44 }
  0xe6   : > { %v621_v49 = vmax.f32 %v551_v46, 0.0  ;;  %v566_v50 = vadd.f32 %v1958_v48, %v2499_v36  ;;  %2078 = vmatpush3.msra.mxu1 %v871_v22  ;;  %v856_v22 = vld [vmem:[%s3006_s5] sm:$0xff] }
  0xe7   : > { %v560_v51 = vpop.f32.mrf.mxu0  ;;  %2063 = vmatprep.subr.mxu1 %v2408_v23  ;;  %2036 = vmatprep.subr.mxu0 %v856_v22 }
  0xe8   : > { %v561_v52 = vadd.f32 %v2499_v36, %v560_v51  ;;  %1985 = vmatprep.mubr.msk.f32.mxu1 %vm646_vm1, %v621_v49  ;;  %2079 = vmatpush3.msra.mxu1 %v2408_v23  ;;  %v624_v53 = vmax.f32 %v566_v50, 0.0  ;;  %v1055_v23 = vld [vmem:[%s3008_s7 + $0x78] sm:$0xff] }
  0xe9   : > { %1986 = vmatmul.mubr.msk.f32.gmra.mxu1 %vm646_vm1, %v622_v47  ;;  %v1961_v54 = vpop.f32.mrf.mxu0  ;;  %2064 = vmatprep.subr.mxu1 %v2413_v24 }
  0xea   : > { %v623_v55 = vmax.f32 %v561_v52, 0.0  ;;  %v576_v56 = vadd.f32 %v1961_v54, %v2499_v36  ;;  %2080 = vmatpush3.msra.mxu1 %v2413_v24  ;;  %2037 = vmatpush3.msra.mxu0 %v856_v22  ;;  %v1053_v24 = vld [vmem:[%s3008_s7 + $0x68] sm:$0xff]  ;;  %v1052_v54 = vld [vmem:[%s3008_s7 + $0x60] sm:$0xff] }
  0xeb   : > { %v570_v57 = vpop.f32.mrf.mxu0  ;;  %2065 = vmatprep.subr.mxu1 %v2420_v25  ;;  %1311 = vmatprep.subr.mxu0 %v1055_v23 }
  0xec   : > { %1988 = vmatprep.mubr.msk.f32.mxu1 %vm646_vm1, %v623_v55  ;;  %v571_v58 = vadd.f32 %v2499_v36, %v570_v57  ;;  %2081 = vmatpush3.msra.mxu1 %v2420_v25  ;;  %v626_v59 = vmax.f32 %v576_v56, 0.0  ;;  %v2578_v25 = vld [vmem:[%s3005_s4] ss:$0 sm:$0xff]  ;;  %v1049_v56 = vld [vmem:[%s3008_s7 + $0x48] sm:$0xff] }
  0xed   : > { %1989 = vmatmul.mubr.msk.f32.gmra.mxu1 %vm646_vm1, %v624_v53  ;;  %v1964_v60 = vpop.f32.mrf.mxu0  ;;  %2066 = vmatprep.subr.mxu1 %v2427_v26 }
  0xee   : > { %v625_v61 = vmax.f32 %v571_v58, 0.0  ;;  %v586_v62 = vadd.f32 %v1964_v60, %v2499_v36  ;;  %2082 = vmatpush3.msra.mxu1 %v2427_v26  ;;  %v1048_v58 = vld [vmem:[%s3008_s7 + $0x40] sm:$0xff] }
  0xef   : > { %v580_v63 = vpop.f32.mrf.mxu0  ;;  %2067 = vmatprep.subr.mxu1 %v2434_v27 }
  0xf0   : > { %1991 = vmatprep.mubr.msk.f32.mxu1 %vm646_vm1, %v625_v61  ;;  %v581_v0 = vadd.f32 %v2499_v36, %v580_v63  ;;  %2083 = vmatpush3.msra.mxu1 %v2434_v27  ;;  %v628_v1 = vmax.f32 %v586_v62, 0.0 }
  0xf1   : > { %1992 = vmatmul.mubr.msk.f32.gmra.mxu1 %vm646_vm1, %v626_v59  ;;  %v1967_v2 = vpop.f32.mrf.mxu0  ;;  %2068 = vmatprep.subr.mxu1 %v2441_v28 }
  0xf2   : > { %v627_v3 = vmax.f32 %v581_v0, 0.0  ;;  %v596_v4 = vadd.f32 %v1967_v2, %v2499_v36  ;;  %2084 = vmatpush3.msra.mxu1 %v2441_v28  ;;  %v1045_v0 = vld [vmem:[%s3008_s7 + $0x28] sm:$0xff]  ;;  %v1044_v2 = vld [vmem:[%s3008_s7 + $0x20] sm:$0xff] }
  0xf3   : > { %v590_v5 = vpop.f32.mrf.mxu0  ;;  %2069 = vmatprep.subr.mxu1 %v2448_v29 }
  0xf4   : > { %1994 = vmatprep.mubr.msk.f32.mxu1 %vm646_vm1, %v627_v3  ;;  %v591_v6 = vadd.f32 %v2499_v36, %v590_v5  ;;  %2085 = vmatpush3.msra.mxu1 %v2448_v29  ;;  %v630_v7 = vmax.f32 %v596_v4, 0.0  ;;  %v1046_v3 = vld [vmem:[%s3008_s7 + $0x30] sm:$0xff]  ;;  %v1041_v4 = vld [vmem:[%s3008_s7 + $0x8] sm:$0xff]  ;;  %v1043_v5 = vld [vmem:[%s3008_s7 + $0x18] sm:$0xff] }
  0xf5   : > { %1995 = vmatmul.mubr.msk.f32.gmra.mxu1 %vm646_vm1, %v628_v1  ;;  %v1970_v8 = vpop.f32.mrf.mxu0  ;;  %2070 = vmatprep.subr.mxu1 %v2455_v30  ;;  %v1047_v1 = vld [vmem:[%s3008_s7 + $0x38] sm:$0xff] }
  0xf6   : > { %v629_v9 = vmax.f32 %v591_v6, 0.0  ;;  %v606_v10 = vadd.f32 %v1970_v8, %v2499_v36  ;;  %2086 = vmatpush3.msra.mxu1 %v2455_v30  ;;  %v1040_v6 = vld [vmem:[%s3008_s7] sm:$0xff]  ;;  %v2233_v8 = vmov 0.0  }
  0xf7   : > { %v600_v11 = vpop.f32.mrf.mxu0  ;;  %2071 = vmatprep.subr.mxu1 %v2462_v31 }
  0xf8   : > { %1997 = vmatprep.mubr.msk.f32.mxu1 %vm646_vm1, %v629_v9  ;;  %v601_v12 = vadd.f32 %v2499_v36, %v600_v11  ;;  %2087 = vmatpush3.msra.mxu1 %v2462_v31  ;;  %v632_v13 = vmax.f32 %v606_v10, 0.0  ;;  %v1054_v31 = vld [vmem:[%s3008_s7 + $0x70] sm:$0xff]  ;;  %v2663_v10 = vld [vmem:[%s3007_s6] ss:$0 sm:$0xff] }
  0xf9   : > { %1998 = vmatmul.mubr.msk.f32.gmra.mxu1 %vm646_vm1, %v630_v7  ;;  %v1973_v14 = vpop.f32.mrf.mxu0  ;;  %2072 = vmatprep.subr.mxu1 %v2469_v32  ;;  %v1042_v7 = vld [vmem:[%s3008_s7 + $0x10] sm:$0xff] }
  0xfa   : > { %v631_v15 = vmax.f32 %v601_v12, 0.0  ;;  %v616_v16 = vadd.f32 %v1973_v14, %v2499_v36  ;;  %2088 = vmatpush3.msra.mxu1 %v2469_v32 }
  0xfb   : > { %v610_v17 = vpop.f32.mrf.mxu0  ;;  %2073 = vmatprep.subr.mxu1 %v2476_v33 }
  0xfc   : > { %2000 = vmatprep.mubr.msk.f32.mxu1 %vm646_vm1, %v631_v15  ;;  %v611_v18 = vadd.f32 %v2499_v36, %v610_v17  ;;  %2089 = vmatpush3.msra.mxu1 %v2476_v33  ;;  %v634_v19 = vmax.f32 %v616_v16, 0.0  ;;  %v1051_v33 = vld [vmem:[%s3008_s7 + $0x58] sm:$0xff] }
  0xfd   : > { %2001 = vmatmul.mubr.msk.f32.gmra.mxu1 %vm646_vm1, %v632_v13  ;;  %2074 = vmatprep.subr.mxu1 %v2483_v34 }
  0xfe   : > { %v633_v20 = vmax.f32 %v611_v18, 0.0  ;;  %2090 = vmatpush3.msra.mxu1 %v2483_v34 }
  0xff   : > { %2075 = vmatprep.subr.mxu1 %v2490_v35 }
 0x100   : > { %2003 = vmatprep.mubr.msk.f32.mxu1 %vm646_vm1, %v633_v20  ;;  %2091 = vmatpush3.msra.mxu1 %v2490_v35  ;;  %v1050_v35 = vld [vmem:[%s3008_s7 + $0x50] sm:$0xff] }
 0x101   : > { %2004 = vmatmul.mubr.msk.f32.gmra.mxu1 %vm646_vm1, %v634_v19  ;;  %2076 = vmatprep.subr.mxu1 %v857_v21 }
 0x102   : > { %2092 = vmatpush3.msra.mxu1 %v857_v21 }
 0x103   : > { %2077 = vmatprep.subr.mxu1 %v856_v22 }
 0x104   : > { %2093 = vmatpush3.msra.mxu1 %v856_v22 }
 0x105   : > { %1150 = vmatprep.subr.mxu1 %v1053_v24 }
 0x1a5   : > { %v1984_v26 = vpop.f32.mrf.mxu1 }
 0x1a6   : > { %v767_v27 = vadd.f32 %v1984_v26, %v2578_v25 }
 0x1a7   : > { %v761_v28 = vpop.f32.mrf.mxu1 }
 0x1a8   : > { %841 = vst [vmem:[%s2583_s25 + $0x8] sm:$0xff] %v767_v27  ;;  %v762_v29 = vadd.f32 %v2578_v25, %v761_v28 }
 0x1a9   : > { %v1987_v30 = vpop.f32.mrf.mxu1 }
 0x1aa   : > { %840 = vst [vmem:[%s2583_s25] sm:$0xff] %v762_v29  ;;  %v777_v32 = vadd.f32 %v1987_v30, %v2578_v25  ;;  %2038 = vmatprep.mubr.f32.mxu0 %v762_v29 }
 0x1ab   : > { %v771_v34 = vpop.f32.mrf.mxu1  ;;  %2039 = vmatmul.mubr.f32.vlgmr.msra.gmra.mxu0 %v767_v27 }
 0x1ac   : > { %843 = vst [vmem:[%s2583_s25 + $0x18] sm:$0xff] %v777_v32  ;;  %v772_v36 = vadd.f32 %v2578_v25, %v771_v34  ;;  %1312 = vmatpush1.msra.mxu0 %v1054_v31 }
 0x1ad   : > { %v1990_v37 = vpop.f32.mrf.mxu1  ;;  %1313 = vmatprep.subr.mxu0 %v1051_v33 }
 0x1ae   : > { %842 = vst [vmem:[%s2583_s25 + $0x10] sm:$0xff] %v772_v36  ;;  %v787_v38 = vadd.f32 %v1990_v37, %v2578_v25  ;;  %2041 = vmatprep.mubr.f32.mxu0 %v772_v36  ;;  %1314 = vmatpush1.msra.mxu0 %v1050_v35 }
 0x1af   : > { %v781_v39 = vpop.f32.mrf.mxu1  ;;  %2042 = vmatmul.mubr.f32.gmra.mxu0 %v777_v32  ;;  %1315 = vmatprep.subr.mxu0 %v1047_v1 }
 0x1b0   : > { %845 = vst [vmem:[%s2583_s25 + $0x28] sm:$0xff] %v787_v38  ;;  %v782_v40 = vadd.f32 %v2578_v25, %v781_v39  ;;  %1316 = vmatpush1.msra.mxu0 %v1046_v3 }
 0x1b1   : > { %v1993_v41 = vpop.f32.mrf.mxu1  ;;  %1317 = vmatprep.subr.mxu0 %v1043_v5 }
 0x1b2   : > { %844 = vst [vmem:[%s2583_s25 + $0x20] sm:$0xff] %v782_v40  ;;  %2044 = vmatprep.mubr.f32.mxu0 %v782_v40  ;;  %v797_v42 = vadd.f32 %v1993_v41, %v2578_v25  ;;  %1318 = vmatpush1.msra.mxu0 %v1042_v7 }
 0x1b3   : > { %2045 = vmatmul.mubr.f32.gmra.mxu0 %v787_v38  ;;  %v791_v43 = vpop.f32.mrf.mxu1 }
 0x1b4   : > { %847 = vst [vmem:[%s2583_s25 + $0x38] sm:$0xff] %v797_v42  ;;  %v792_v44 = vadd.f32 %v2578_v25, %v791_v43 }
 0x1b5   : > { %v1996_v45 = vpop.f32.mrf.mxu1 }
 0x1b6   : > { %846 = vst [vmem:[%s2583_s25 + $0x30] sm:$0xff] %v792_v44  ;;  %2047 = vmatprep.mubr.f32.mxu0 %v792_v44  ;;  %v807_v46 = vadd.f32 %v1996_v45, %v2578_v25 }
 0x1b7   : > { %2048 = vmatmul.mubr.f32.gmra.mxu0 %v797_v42  ;;  %v801_v47 = vpop.f32.mrf.mxu1 }
 0x1b8   : > { %849 = vst [vmem:[%s2583_s25 + $0x48] sm:$0xff] %v807_v46  ;;  %v802_v48 = vadd.f32 %v2578_v25, %v801_v47 }
 0x1b9   : > { %v1999_v49 = vpop.f32.mrf.mxu1 }
 0x1ba   : > { %848 = vst [vmem:[%s2583_s25 + $0x40] sm:$0xff] %v802_v48  ;;  %2050 = vmatprep.mubr.f32.mxu0 %v802_v48  ;;  %v817_v50 = vadd.f32 %v1999_v49, %v2578_v25 }
 0x1bb   : > { %2051 = vmatmul.mubr.f32.gmra.mxu0 %v807_v46  ;;  %v811_v51 = vpop.f32.mrf.mxu1 }
 0x1bc   : > { %851 = vst [vmem:[%s2583_s25 + $0x58] sm:$0xff] %v817_v50  ;;  %v812_v52 = vadd.f32 %v2578_v25, %v811_v51  ;;  %1351 = vmatprep.mubr.f32.mxu0 %v2233_v8 }
 0x1bd   : > { %v2002_v53 = vpop.f32.mrf.mxu1 }
 0x1be   : > { %850 = vst [vmem:[%s2583_s25 + $0x50] sm:$0xff] %v812_v52  ;;  %2053 = vmatprep.mubr.f32.mxu1 %v812_v52  ;;  %v827_v55 = vadd.f32 %v2002_v53, %v2578_v25 }
 0x1bf   : > { %2054 = vmatmul.mubr.f32.vlgmr.msra.gmra.mxu1 %v817_v50  ;;  %v821_v57 = vpop.f32.mrf.mxu1 }
 0x1c0   : > { %853 = vst [vmem:[%s2583_s25 + $0x68] sm:$0xff] %v827_v55  ;;  %v822_v59 = vadd.f32 %v2578_v25, %v821_v57  ;;  %1151 = vmatpush1.msra.mxu1 %v1052_v54 }
 0x1c1   : > { %v2005_v60 = vpop.f32.mrf.mxu1  ;;  %1152 = vmatprep.subr.mxu1 %v1049_v56 }
 0x1c2   : > { %852 = vst [vmem:[%s2583_s25 + $0x60] sm:$0xff] %v822_v59  ;;  %2056 = vmatprep.mubr.f32.mxu1 %v822_v59  ;;  %v837_v61 = vadd.f32 %v2005_v60, %v2578_v25  ;;  %1153 = vmatpush1.msra.mxu1 %v1048_v58 }
 0x1c3   : > { %2057 = vmatmul.mubr.f32.gmra.mxu1 %v827_v55  ;;  %v831_v62 = vpop.f32.mrf.mxu1  ;;  %1154 = vmatprep.subr.mxu1 %v1045_v0 }
 0x1c4   : > { %855 = vst [vmem:[%s2583_s25 + $0x78] sm:$0xff] %v837_v61  ;;  %v832_v63 = vadd.f32 %v2578_v25, %v831_v62  ;;  %1155 = vmatpush1.msra.mxu1 %v1044_v2 }
 0x1c5   : > { %1156 = vmatprep.subr.mxu1 %v1041_v4 }
 0x1c6   : > { %854 = vst [vmem:[%s2583_s25 + $0x70] sm:$0xff] %v832_v63  ;;  %2059 = vmatprep.mubr.f32.mxu1 %v832_v63  ;;  %1157 = vmatpush1.msra.mxu1 %v1040_v6 }
 0x1c7   : > { %2060 = vmatmul.mubr.f32.gmra.mxu1 %v837_v61 }
 0x1c8   : > { %1190 = vmatprep.mubr.f32.mxu1 %v2233_v8 }
 0x26b   : > { %v2040_v9 = vpop.f32.mrf.mxu0 }
 0x26c   : > { %v951_v14 = vadd.f32 %v2040_v9, %v2663_v10 }
 0x26d   : > { %v945_v11 = vpop.f32.mrf.mxu0 }
 0x26e   : > { %v946_v12 = vadd.f32 %v2663_v10, %v945_v11  ;;  %v1025_v17 = vmax.f32 %v951_v14, 0.0 }
 0x26f   : > { %v2043_v13 = vpop.f32.mrf.mxu0 }
 0x270   : > { %v1024_v15 = vmax.f32 %v946_v12, 0.0  ;;  %v961_v20 = vadd.f32 %v2043_v13, %v2663_v10 }
 0x271   : > { %v955_v16 = vpop.f32.mrf.mxu0 }
 0x272   : > { %1834 = vmatmul.mubr.msk.f32.vlgmr.msra.gmra.mxu1 %vm646_vm1, %v1024_v15  ;;  %1850 = vmatmul.mubr.msk.f32.vlgmr.msra.gmra.mxu0 %vm646_vm1, %v1024_v15  ;;  %v956_v18 = vadd.f32 %v2663_v10, %v955_v16  ;;  %v1027_v23 = vmax.f32 %v961_v20, 0.0 }
 0x273   : > { %1196 = vmatprep.mubr.f32.mxu1 %v2233_v8  ;;  %1357 = vmatprep.mubr.f32.mxu0 %v2233_v8  ;;  %v2046_v19 = vpop.f32.mrf.mxu0 }
 0x274   : > { %v1026_v21 = vmax.f32 %v956_v18, 0.0  ;;  %v971_v26 = vadd.f32 %v2046_v19, %v2663_v10 }
 0x275   : > { %v965_v22 = vpop.f32.mrf.mxu0 }
 0x276   : > { %1835 = vmatmul.mubr.msk.f32.gmra.mxu1 %vm646_vm1, %v1025_v17  ;;  %1851 = vmatmul.mubr.msk.f32.gmra.mxu0 %vm646_vm1, %v1025_v17  ;;  %v966_v24 = vadd.f32 %v2663_v10, %v965_v22  ;;  %v1029_v29 = vmax.f32 %v971_v26, 0.0 }
 0x277   : > { %1202 = vmatprep.mubr.f32.mxu1 %v2233_v8  ;;  %1363 = vmatprep.mubr.f32.mxu0 %v2233_v8  ;;  %v2049_v25 = vpop.f32.mrf.mxu0 }
 0x278   : > { %v1028_v27 = vmax.f32 %v966_v24, 0.0  ;;  %v981_v32 = vadd.f32 %v2049_v25, %v2663_v10 }
 0x279   : > { %v975_v28 = vpop.f32.mrf.mxu0 }
 0x27a   : > { %1836 = vmatmul.mubr.msk.f32.gmra.mxu1 %vm646_vm1, %v1026_v21  ;;  %1852 = vmatmul.mubr.msk.f32.gmra.mxu0 %vm646_vm1, %v1026_v21  ;;  %v976_v30 = vadd.f32 %v2663_v10, %v975_v28  ;;  %v1031_v35 = vmax.f32 %v981_v32, 0.0 }
 0x27b   : > { %1208 = vmatprep.mubr.f32.mxu1 %v2233_v8  ;;  %1369 = vmatprep.mubr.f32.mxu0 %v2233_v8  ;;  %v2052_v31 = vpop.f32.mrf.mxu0 }
 0x27c   : > { %v1030_v33 = vmax.f32 %v976_v30, 0.0  ;;  %v991_v38 = vadd.f32 %v2052_v31, %v2663_v10 }
 0x27d   : > { %v985_v34 = vpop.f32.mrf.mxu0 }
 0x27e   : > { %1837 = vmatmul.mubr.msk.f32.gmra.mxu1 %vm646_vm1, %v1027_v23  ;;  %1853 = vmatmul.mubr.msk.f32.gmra.mxu0 %vm646_vm1, %v1027_v23  ;;  %v986_v36 = vadd.f32 %v2663_v10, %v985_v34  ;;  %v1033_v41 = vmax.f32 %v991_v38, 0.0 }
 0x27f   : > { %1214 = vmatprep.mubr.f32.mxu1 %v2233_v8  ;;  %1375 = vmatprep.mubr.f32.mxu0 %v2233_v8  ;;  %v2055_v37 = vpop.f32.mrf.mxu1 }
 0x280   : > { %v1032_v39 = vmax.f32 %v986_v36, 0.0  ;;  %v1001_v44 = vadd.f32 %v2055_v37, %v2663_v10 }
 0x281   : > { %v995_v40 = vpop.f32.mrf.mxu1 }
 0x282   : > { %1838 = vmatmul.mubr.msk.f32.gmra.mxu1 %vm646_vm1, %v1028_v27  ;;  %1854 = vmatmul.mubr.msk.f32.gmra.mxu0 %vm646_vm1, %v1028_v27  ;;  %v996_v42 = vadd.f32 %v2663_v10, %v995_v40  ;;  %v1035_v47 = vmax.f32 %v1001_v44, 0.0 }
 0x283   : > { %1220 = vmatprep.mubr.f32.mxu1 %v2233_v8  ;;  %1381 = vmatprep.mubr.f32.mxu0 %v2233_v8  ;;  %v2058_v43 = vpop.f32.mrf.mxu1 }
 0x284   : > { %v1034_v45 = vmax.f32 %v996_v42, 0.0  ;;  %v1011_v50 = vadd.f32 %v2058_v43, %v2663_v10 }
 0x285   : > { %v1005_v46 = vpop.f32.mrf.mxu1 }
 0x286   : > { %1839 = vmatmul.mubr.msk.f32.gmra.mxu1 %vm646_vm1, %v1029_v29  ;;  %1855 = vmatmul.mubr.msk.f32.gmra.mxu0 %vm646_vm1, %v1029_v29  ;;  %v1006_v48 = vadd.f32 %v2663_v10, %v1005_v46  ;;  %v1037_v53 = vmax.f32 %v1011_v50, 0.0 }
 0x287   : > { %1226 = vmatprep.mubr.f32.mxu1 %v2233_v8  ;;  %1387 = vmatprep.mubr.f32.mxu0 %v2233_v8  ;;  %v2061_v49 = vpop.f32.mrf.mxu1 }
 0x288   : > { %v1036_v51 = vmax.f32 %v1006_v48, 0.0  ;;  %v1021_v55 = vadd.f32 %v2061_v49, %v2663_v10 }
 0x289   : > { %v1015_v52 = vpop.f32.mrf.mxu1 }
 0x28a   : > { %1840 = vmatmul.mubr.msk.f32.gmra.mxu1 %vm646_vm1, %v1030_v33  ;;  %1856 = vmatmul.mubr.msk.f32.gmra.mxu0 %vm646_vm1, %v1030_v33  ;;  %v1016_v54 = vadd.f32 %v2663_v10, %v1015_v52  ;;  %v1039_v57 = vmax.f32 %v1021_v55, 0.0 }
 0x28b   : > { %1232 = vmatprep.mubr.f32.mxu1 %v2233_v8  ;;  %1393 = vmatprep.mubr.f32.mxu0 %v2233_v8 }
 0x28c   : > { %v1038_v56 = vmax.f32 %v1016_v54, 0.0 }
 0x28e   : > { %1841 = vmatmul.mubr.msk.f32.gmra.mxu1 %vm646_vm1, %v1031_v35  ;;  %1857 = vmatmul.mubr.msk.f32.gmra.mxu0 %vm646_vm1, %v1031_v35 }
 0x28f   : > { %1238 = vmatprep.mubr.f32.mxu1 %v2233_v8  ;;  %1399 = vmatprep.mubr.f32.mxu0 %v2233_v8 }
 0x292   : > { %1842 = vmatmul.mubr.msk.f32.gmra.mxu1 %vm646_vm1, %v1032_v39  ;;  %1858 = vmatmul.mubr.msk.f32.gmra.mxu0 %vm646_vm1, %v1032_v39 }
 0x293   : > { %1244 = vmatprep.mubr.f32.mxu1 %v2233_v8  ;;  %1405 = vmatprep.mubr.f32.mxu0 %v2233_v8 }
 0x296   : > { %1843 = vmatmul.mubr.msk.f32.gmra.mxu1 %vm646_vm1, %v1033_v41  ;;  %1859 = vmatmul.mubr.msk.f32.gmra.mxu0 %vm646_vm1, %v1033_v41 }
 0x297   : > { %1250 = vmatprep.mubr.f32.mxu1 %v2233_v8  ;;  %1411 = vmatprep.mubr.f32.mxu0 %v2233_v8 }
 0x29a   : > { %1844 = vmatmul.mubr.msk.f32.gmra.mxu1 %vm646_vm1, %v1034_v45  ;;  %1860 = vmatmul.mubr.msk.f32.gmra.mxu0 %vm646_vm1, %v1034_v45 }
 0x29b   : > { %1256 = vmatprep.mubr.f32.mxu1 %v2233_v8  ;;  %1417 = vmatprep.mubr.f32.mxu0 %v2233_v8 }
 0x29e   : > { %1845 = vmatmul.mubr.msk.f32.gmra.mxu1 %vm646_vm1, %v1035_v47  ;;  %1861 = vmatmul.mubr.msk.f32.gmra.mxu0 %vm646_vm1, %v1035_v47 }
 0x29f   : > { %1262 = vmatprep.mubr.f32.mxu1 %v2233_v8  ;;  %1423 = vmatprep.mubr.f32.mxu0 %v2233_v8 }
 0x2a2   : > { %1846 = vmatmul.mubr.msk.f32.gmra.mxu1 %vm646_vm1, %v1036_v51  ;;  %1862 = vmatmul.mubr.msk.f32.gmra.mxu0 %vm646_vm1, %v1036_v51 }
 0x2a3   : > { %1268 = vmatprep.mubr.f32.mxu1 %v2233_v8  ;;  %1429 = vmatprep.mubr.f32.mxu0 %v2233_v8 }
 0x2a6   : > { %1847 = vmatmul.mubr.msk.f32.gmra.mxu1 %vm646_vm1, %v1037_v53  ;;  %1863 = vmatmul.mubr.msk.f32.gmra.mxu0 %vm646_vm1, %v1037_v53 }
 0x2a7   : > { %1274 = vmatprep.mubr.f32.mxu1 %v2233_v8  ;;  %1435 = vmatprep.mubr.f32.mxu0 %v2233_v8 }
 0x2aa   : > { %1848 = vmatmul.mubr.msk.f32.gmra.mxu1 %vm646_vm1, %v1038_v56  ;;  %1864 = vmatmul.mubr.msk.f32.gmra.mxu0 %vm646_vm1, %v1038_v56 }
 0x2ab   : > { %1280 = vmatprep.mubr.f32.mxu1 %v2233_v8  ;;  %1441 = vmatprep.mubr.f32.mxu0 %v2233_v8 }
 0x2ae   : > { %1849 = vmatmul.mubr.msk.f32.gmra.mxu1 %vm646_vm1, %v1039_v57  ;;  %1865 = vmatmul.mubr.msk.f32.gmra.mxu0 %vm646_vm1, %v1039_v57 }
 0x2af   : > { %2154 = shalt.err (!%p2151_p3)
}
 0x2b0   : > { %s2155_s25 = scalar_lea.hbm %s2749_s24, 2048  ;;  %s2159_s13 = scalar_lea.hbm %s3012_s11, 4096 }
 0x2b1   : > { %p2156_p4 = scmp.ne.s32.totalorder %s2749_s24, %s2155_s25  ;;  %p2160_p9 = scmp.lt.s32.totalorder %s2749_s24, %s3012_s11 }
 0x2b2   : > { %p2161_p10 = scmp.lt.s32.totalorder %s2159_s13, %s2155_s25 }
 0x2b3   : > { %p2157_p7 = pnand %p2156_p4, %p2336_p5 }
 0x2b4   : > { %p2162_p11 = por %p2161_p10, %p2160_p9 }
 0x2b5   : > { %p2158_p8 = pneg %p2157_p7 }
 0x2b7   : > { %p2163_p12 = pnand %p2162_p11, %p2158_p8 }
 0x2b9   : > { %2166 = shalt.err (!%p2163_p12)
}
 0x2ba   : > { %s3015_s12 = smov 128   ;;  %s2236_s0 = smov 8   ;;  %v1058_v58 = vlaneseq  ;;  %v1056_v62 = vld [vmem:[%s3009_s8] sm:$0xf] }
 0x2bb   : > { %s3022_s1 = scalar_lea.sflag [#allocation5], %s2572_s15  ;;  %v1512_v3 = vld [vmem:[%s3010_s9] sm:$0xf]  ;;  %s3024_s13 = sshll.u32 %s2319_s21, 11 }
 0x2bc   : > { %2095 = dma.vmem_to_hbm [thread:$0]  (%p2336_p5), %s2752_s29, 2048, %s2749_s24, %s3022_s1, %s3015_s12, %s3015_s12, %s2236_s0   ;;  %v1059_v59 = vshrl.u32 %v1058_v58, 7 }
 0x2bd   : > { %s3023_s24 = sshll.u32 %s2572_s15, 7  ;;  %s2955_s30 = scalar_lea.hbm %s3011_s10, %s3024_s13 }
 0x2be   : > { %v1060_v60 = vsub.s32 0, %v1059_v59  ;;  %v1068_v61 = vsub.s32 2, %v1059_v59  ;;  %v1064_v63 = vsub.s32 1, %v1059_v59  ;;  %v1072_v0 = vsub.s32 3, %v1059_v59  ;;  %s2826_s29 = scalar_lea.vmem [#allocation2], %s3023_s24  ;;  %s1663_s25 = scalar_lea.sflag [#allocation3], %s2572_s15 }
 0x2bf   : > { %s1681_s22 = sshll.u32 %s2826_s29, 4  ;;  %s2237_s24 = smov [#allocation2]   ;;  %s2957_s22 = int_to_ptr.vmem [resolvable:$true] %s1681_s22 }
 0x2c0   : > { %v2783_v1 = vrot.slane %v1056_v62, %v1060_v60  ;;  %v2785_v2 = vrot.slane %v1056_v62, %v1068_v61  ;;  %v2790_v4 = vrot.slane %v1056_v62, %v1064_v63  ;;  %v2792_v5 = vrot.slane %v1056_v62, %v1072_v0  ;;  %s2167_s14 = scalar_lea.vmem %s2957_s22, 2048  ;;  %s2171_s12 = sshll.u32 %s2237_s24, 4  ;;  %s2172_s12 = int_to_ptr.vmem [resolvable:$false] %s2171_s12 }
 0x2c1   : > { %v2796_v10 = vrot.slane %v1512_v3, %v1060_v60  ;;  %v2799_v15 = vrot.slane %v1512_v3, %v1064_v63  ;;  %v2802_v20 = vrot.slane %v1512_v3, %v1068_v61  ;;  %v2805_v23 = vrot.slane %v1512_v3, %v1072_v0  ;;  %p2168_p13 = scmp.ne.s32.totalorder %s2957_s22, %s2167_s14  ;;  %s2173_s21 = scalar_lea.vmem %s2172_s12, 4096 }
 0x2c2   : > { %p2174_p2 = scmp.lt.s32.totalorder %s2957_s22, %s2172_s12  ;;  %p2175_p3 = scmp.lt.s32.totalorder %s2173_s21, %s2167_s14 }
 0x2c3   : > { %p2169_p0 = pnand %p2168_p13, %p2336_p5 }
 0x2c4   : > { %p2176_p4 = por %p2175_p3, %p2174_p2 }
 0x2c5   : > { %p2170_p1 = pneg %p2169_p0 }
 0x2c7   : > { %p2177_p7 = pnand %p2176_p4, %p2170_p1 }
 0x332   : > { %v1192_v6 = vpop.f32.mrf.mxu1  ;;  %v1353_v7 = vpop.f32.mrf.mxu0 }
 0x333   : > { %v1193_v8 = vadd.f32 %v1192_v6, %v2783_v1  ;;  %v1354_v9 = vadd.f32 %v1353_v7, %v2785_v2 }
 0x334   : > { %v1194_v11 = vpop.f32.mrf.mxu1  ;;  %v1355_v12 = vpop.f32.mrf.mxu0 }
 0x335   : > { %v1448_v13 = vmax.f32 %v1193_v8, 0.0  ;;  %v1195_v14 = vadd.f32 %v1194_v11, %v2790_v4  ;;  %v1356_v16 = vadd.f32 %v1355_v12, %v2792_v5  ;;  %v1450_v19 = vmax.f32 %v1354_v9, 0.0 }
 0x336   : > { %v1198_v17 = vpop.f32.mrf.mxu1  ;;  %v1359_v18 = vpop.f32.mrf.mxu0 }
 0x337   : > { %v1449_v21 = vmax.f32 %v1195_v14, 0.0  ;;  %v1534_v22 = vmul.f32 %v2796_v10, %v1448_v13  ;;  %v1199_v24 = vadd.f32 %v1198_v17, %v2783_v1  ;;  %v1360_v25 = vadd.f32 %v1359_v18, %v2785_v2 }
 0x338   : > { %v1200_v26 = vpop.f32.mrf.mxu1  ;;  %v1361_v27 = vpop.f32.mrf.mxu0  ;;  %v1451_v29 = vmax.f32 %v1356_v16, 0.0  ;;  %v1536_v36 = vmul.f32 %v2802_v20, %v1450_v19 }
 0x339   : > { %v1535_v28 = vmul.f32 %v2799_v15, %v1449_v21  ;;  %v1201_v30 = vadd.f32 %v1200_v26, %v2790_v4  ;;  %v1362_v31 = vadd.f32 %v1361_v27, %v2792_v5  ;;  %v1452_v32 = vmax.f32 %v1199_v24, 0.0 }
 0x33a   : > { %v1454_v33 = vmax.f32 %v1360_v25, 0.0  ;;  %v1204_v34 = vpop.f32.mrf.mxu1  ;;  %v1365_v35 = vpop.f32.mrf.mxu0  ;;  %v1537_v44 = vmul.f32 %v2805_v23, %v1451_v29 }
 0x33b   : > { %v1598_v37 = vadd.f32 %v1535_v28, %v1534_v22  ;;  %v1453_v38 = vmax.f32 %v1201_v30, 0.0  ;;  %v1205_v39 = vadd.f32 %v1204_v34, %v2783_v1  ;;  %v1455_v40 = vmax.f32 %v1362_v31, 0.0 }
 0x33c   : > { %v1366_v41 = vadd.f32 %v1365_v35, %v2785_v2  ;;  %v1206_v42 = vpop.f32.mrf.mxu1  ;;  %v1367_v43 = vpop.f32.mrf.mxu0  ;;  %v1538_v46 = vmul.f32 %v2796_v10, %v1452_v32  ;;  %v1540_v48 = vmul.f32 %v2802_v20, %v1454_v33 }
 0x33d   : > { %v1614_v45 = vadd.f32 %v1598_v37, %v1536_v36  ;;  %v1539_v47 = vmul.f32 %v2799_v15, %v1453_v38  ;;  %v1456_v49 = vmax.f32 %v1205_v39, 0.0  ;;  %v1207_v50 = vadd.f32 %v1206_v42, %v2790_v4 }
 0x33e   : > { %v1368_v51 = vadd.f32 %v1367_v43, %v2792_v5  ;;  %v1210_v52 = vpop.f32.mrf.mxu1  ;;  %v1371_v53 = vpop.f32.mrf.mxu0  ;;  %v1458_v56 = vmax.f32 %v1366_v41, 0.0  ;;  %v1541_v58 = vmul.f32 %v2805_v23, %v1455_v40 }
 0x33f   : > { %v1630_v54 = vadd.f32 %v1614_v45, %v1537_v44  ;;  %v1599_v55 = vadd.f32 %v1539_v47, %v1538_v46  ;;  %v1211_v57 = vadd.f32 %v1210_v52, %v2783_v1  ;;  %v1457_v59 = vmax.f32 %v1207_v50, 0.0 }
 0x340   : > { %v1372_v60 = vadd.f32 %v1371_v53, %v2785_v2  ;;  %v1212_v61 = vpop.f32.mrf.mxu1  ;;  %v1373_v62 = vpop.f32.mrf.mxu0  ;;  %v1542_v7 = vmul.f32 %v2796_v10, %v1456_v49  ;;  %v1459_v9 = vmax.f32 %v1368_v51, 0.0  ;;  %v1544_v14 = vmul.f32 %v2802_v20, %v1458_v56 }
 0x341   : > { %1646 = vst [vmem:[%s2826_s29] sm:$0xff] %v1630_v54  ;;  %v1615_v63 = vadd.f32 %v1599_v55, %v1540_v48  ;;  %v1460_v0 = vmax.f32 %v1211_v57, 0.0  ;;  %v1213_v3 = vadd.f32 %v1212_v61, %v2790_v4  ;;  %v1374_v6 = vadd.f32 %v1373_v62, %v2792_v5 }
 0x342   : > { %v1543_v8 = vmul.f32 %v2799_v15, %v1457_v59  ;;  %v1216_v11 = vpop.f32.mrf.mxu1  ;;  %v1377_v12 = vpop.f32.mrf.mxu0  ;;  %v1462_v16 = vmax.f32 %v1372_v60, 0.0  ;;  %v1545_v30 = vmul.f32 %v2805_v23, %v1459_v9 }
 0x343   : > { %v1631_v13 = vadd.f32 %v1615_v63, %v1541_v58  ;;  %v1461_v17 = vmax.f32 %v1213_v3, 0.0  ;;  %v1546_v19 = vmul.f32 %v2796_v10, %v1460_v0  ;;  %v1217_v21 = vadd.f32 %v1216_v11, %v2783_v1 }
 0x344   : > { %v1600_v18 = vadd.f32 %v1543_v8, %v1542_v7  ;;  %v1378_v22 = vadd.f32 %v1377_v12, %v2785_v2  ;;  %v1218_v24 = vpop.f32.mrf.mxu1  ;;  %v1379_v25 = vpop.f32.mrf.mxu0  ;;  %v1463_v27 = vmax.f32 %v1374_v6, 0.0  ;;  %v1548_v36 = vmul.f32 %v2802_v20, %v1462_v16 }
 0x345   : > { %1647 = vst [vmem:[%s2826_s29 + $0x8] sm:$0xff] %v1631_v13  ;;  %v1547_v26 = vmul.f32 %v2799_v15, %v1461_v17  ;;  %v1219_v28 = vadd.f32 %v1218_v24, %v2790_v4  ;;  %v1380_v29 = vadd.f32 %v1379_v25, %v2792_v5  ;;  %v1464_v32 = vmax.f32 %v1217_v21, 0.0 }
 0x346   : > { %v1616_v31 = vadd.f32 %v1600_v18, %v1544_v14  ;;  %v1466_v33 = vmax.f32 %v1378_v22, 0.0  ;;  %v1222_v34 = vpop.f32.mrf.mxu1  ;;  %v1383_v35 = vpop.f32.mrf.mxu0  ;;  %v1549_v45 = vmul.f32 %v2805_v23, %v1463_v27 }
 0x347   : > { %v1601_v37 = vadd.f32 %v1547_v26, %v1546_v19  ;;  %v1465_v38 = vmax.f32 %v1219_v28, 0.0  ;;  %v1223_v39 = vadd.f32 %v1222_v34, %v2783_v1  ;;  %v1467_v41 = vmax.f32 %v1380_v29, 0.0 }
 0x348   : > { %v1632_v40 = vadd.f32 %v1616_v31, %v1545_v30  ;;  %v1384_v42 = vadd.f32 %v1383_v35, %v2785_v2  ;;  %v1224_v43 = vpop.f32.mrf.mxu1  ;;  %v1385_v44 = vpop.f32.mrf.mxu0  ;;  %v1550_v47 = vmul.f32 %v2796_v10, %v1464_v32  ;;  %v1552_v49 = vmul.f32 %v2802_v20, %v1466_v33 }
 0x349   : > { %v1617_v46 = vadd.f32 %v1601_v37, %v1548_v36  ;;  %v1551_v48 = vmul.f32 %v2799_v15, %v1465_v38  ;;  %v1468_v50 = vmax.f32 %v1223_v39, 0.0  ;;  %v1225_v51 = vadd.f32 %v1224_v43, %v2790_v4 }
 0x34a   : > { %1648 = vst [vmem:[%s2826_s29 + $0x10] sm:$0xff] %v1632_v40  ;;  %v1386_v52 = vadd.f32 %v1385_v44, %v2792_v5  ;;  %v1228_v53 = vpop.f32.mrf.mxu1  ;;  %v1389_v54 = vpop.f32.mrf.mxu0  ;;  %v1470_v57 = vmax.f32 %v1384_v42, 0.0  ;;  %v1553_v59 = vmul.f32 %v2805_v23, %v1467_v41 }
 0x34b   : > { %v1633_v55 = vadd.f32 %v1617_v46, %v1549_v45  ;;  %v1602_v56 = vadd.f32 %v1551_v48, %v1550_v47  ;;  %v1229_v58 = vadd.f32 %v1228_v53, %v2783_v1  ;;  %v1469_v60 = vmax.f32 %v1225_v51, 0.0 }
 0x34c   : > { %v1390_v61 = vadd.f32 %v1389_v54, %v2785_v2  ;;  %v1230_v62 = vpop.f32.mrf.mxu1  ;;  %v1391_v63 = vpop.f32.mrf.mxu0  ;;  %v1554_v8 = vmul.f32 %v2796_v10, %v1468_v50  ;;  %v1471_v11 = vmax.f32 %v1386_v52, 0.0  ;;  %v1556_v16 = vmul.f32 %v2802_v20, %v1470_v57 }
 0x34d   : > { %1649 = vst [vmem:[%s2826_s29 + $0x18] sm:$0xff] %v1633_v55  ;;  %v1618_v0 = vadd.f32 %v1602_v56, %v1552_v49  ;;  %v1472_v3 = vmax.f32 %v1229_v58, 0.0  ;;  %v1231_v6 = vadd.f32 %v1230_v62, %v2790_v4  ;;  %v1392_v7 = vadd.f32 %v1391_v63, %v2792_v5 }
 0x34e   : > { %v1555_v9 = vmul.f32 %v2799_v15, %v1469_v60  ;;  %v1234_v12 = vpop.f32.mrf.mxu1  ;;  %v1395_v13 = vpop.f32.mrf.mxu0  ;;  %v1474_v17 = vmax.f32 %v1390_v61, 0.0  ;;  %v1557_v31 = vmul.f32 %v2805_v23, %v1471_v11 }
 0x34f   : > { %v1634_v14 = vadd.f32 %v1618_v0, %v1553_v59  ;;  %v1473_v18 = vmax.f32 %v1231_v6, 0.0  ;;  %v1558_v21 = vmul.f32 %v2796_v10, %v1472_v3  ;;  %v1235_v22 = vadd.f32 %v1234_v12, %v2783_v1 }
 0x350   : > { %v1603_v19 = vadd.f32 %v1555_v9, %v1554_v8  ;;  %v1396_v24 = vadd.f32 %v1395_v13, %v2785_v2  ;;  %v1236_v25 = vpop.f32.mrf.mxu1  ;;  %v1397_v26 = vpop.f32.mrf.mxu0  ;;  %v1475_v28 = vmax.f32 %v1392_v7, 0.0  ;;  %v1560_v37 = vmul.f32 %v2802_v20, %v1474_v17 }
 0x351   : > { %1650 = vst [vmem:[%s2826_s29 + $0x20] sm:$0xff] %v1634_v14  ;;  %v1559_v27 = vmul.f32 %v2799_v15, %v1473_v18  ;;  %v1237_v29 = vadd.f32 %v1236_v25, %v2790_v4  ;;  %v1398_v30 = vadd.f32 %v1397_v26, %v2792_v5  ;;  %v1476_v33 = vmax.f32 %v1235_v22, 0.0 }
 0x352   : > { %v1619_v32 = vadd.f32 %v1603_v19, %v1556_v16  ;;  %v1478_v34 = vmax.f32 %v1396_v24, 0.0  ;;  %v1240_v35 = vpop.f32.mrf.mxu1  ;;  %v1401_v36 = vpop.f32.mrf.mxu0  ;;  %v1561_v46 = vmul.f32 %v2805_v23, %v1475_v28 }
 0x353   : > { %v1604_v38 = vadd.f32 %v1559_v27, %v1558_v21  ;;  %v1477_v39 = vmax.f32 %v1237_v29, 0.0  ;;  %v1241_v40 = vadd.f32 %v1240_v35, %v2783_v1  ;;  %v1479_v42 = vmax.f32 %v1398_v30, 0.0 }
 0x354   : > { %v1635_v41 = vadd.f32 %v1619_v32, %v1557_v31  ;;  %v1402_v43 = vadd.f32 %v1401_v36, %v2785_v2  ;;  %v1242_v44 = vpop.f32.mrf.mxu1  ;;  %v1403_v45 = vpop.f32.mrf.mxu0  ;;  %v1562_v48 = vmul.f32 %v2796_v10, %v1476_v33  ;;  %v1564_v50 = vmul.f32 %v2802_v20, %v1478_v34 }
 0x355   : > { %v1620_v47 = vadd.f32 %v1604_v38, %v1560_v37  ;;  %v1563_v49 = vmul.f32 %v2799_v15, %v1477_v39  ;;  %v1480_v51 = vmax.f32 %v1241_v40, 0.0  ;;  %v1243_v52 = vadd.f32 %v1242_v44, %v2790_v4 }
 0x356   : > { %1651 = vst [vmem:[%s2826_s29 + $0x28] sm:$0xff] %v1635_v41  ;;  %v1404_v53 = vadd.f32 %v1403_v45, %v2792_v5  ;;  %v1246_v54 = vpop.f32.mrf.mxu1  ;;  %v1407_v55 = vpop.f32.mrf.mxu0  ;;  %v1482_v58 = vmax.f32 %v1402_v43, 0.0  ;;  %v1565_v60 = vmul.f32 %v2805_v23, %v1479_v42 }
 0x357   : > { %v1636_v56 = vadd.f32 %v1620_v47, %v1561_v46  ;;  %v1605_v57 = vadd.f32 %v1563_v49, %v1562_v48  ;;  %v1247_v59 = vadd.f32 %v1246_v54, %v2783_v1  ;;  %v1481_v61 = vmax.f32 %v1243_v52, 0.0 }
 0x358   : > { %v1408_v62 = vadd.f32 %v1407_v55, %v2785_v2  ;;  %v1248_v63 = vpop.f32.mrf.mxu1  ;;  %v1409_v0 = vpop.f32.mrf.mxu0  ;;  %v1566_v9 = vmul.f32 %v2796_v10, %v1480_v51  ;;  %v1483_v12 = vmax.f32 %v1404_v53, 0.0  ;;  %v1568_v17 = vmul.f32 %v2802_v20, %v1482_v58 }
 0x359   : > { %1652 = vst [vmem:[%s2826_s29 + $0x30] sm:$0xff] %v1636_v56  ;;  %v1621_v3 = vadd.f32 %v1605_v57, %v1564_v50  ;;  %v1484_v6 = vmax.f32 %v1247_v59, 0.0  ;;  %v1249_v7 = vadd.f32 %v1248_v63, %v2790_v4  ;;  %v1410_v8 = vadd.f32 %v1409_v0, %v2792_v5 }
 0x35a   : > { %v1567_v11 = vmul.f32 %v2799_v15, %v1481_v61  ;;  %v1252_v13 = vpop.f32.mrf.mxu1  ;;  %v1413_v14 = vpop.f32.mrf.mxu0  ;;  %v1486_v18 = vmax.f32 %v1408_v62, 0.0  ;;  %v1569_v32 = vmul.f32 %v2805_v23, %v1483_v12 }
 0x35b   : > { %v1637_v16 = vadd.f32 %v1621_v3, %v1565_v60  ;;  %v1485_v19 = vmax.f32 %v1249_v7, 0.0  ;;  %v1570_v22 = vmul.f32 %v2796_v10, %v1484_v6  ;;  %v1253_v24 = vadd.f32 %v1252_v13, %v2783_v1 }
 0x35c   : > { %v1606_v21 = vadd.f32 %v1567_v11, %v1566_v9  ;;  %v1414_v25 = vadd.f32 %v1413_v14, %v2785_v2  ;;  %v1254_v26 = vpop.f32.mrf.mxu1  ;;  %v1415_v27 = vpop.f32.mrf.mxu0  ;;  %v1487_v29 = vmax.f32 %v1410_v8, 0.0  ;;  %v1572_v38 = vmul.f32 %v2802_v20, %v1486_v18 }
 0x35d   : > { %1653 = vst [vmem:[%s2826_s29 + $0x38] sm:$0xff] %v1637_v16  ;;  %v1571_v28 = vmul.f32 %v2799_v15, %v1485_v19  ;;  %v1255_v30 = vadd.f32 %v1254_v26, %v2790_v4  ;;  %v1416_v31 = vadd.f32 %v1415_v27, %v2792_v5  ;;  %v1488_v34 = vmax.f32 %v1253_v24, 0.0 }
 0x35e   : > { %v1622_v33 = vadd.f32 %v1606_v21, %v1568_v17  ;;  %v1490_v35 = vmax.f32 %v1414_v25, 0.0  ;;  %v1258_v36 = vpop.f32.mrf.mxu1  ;;  %v1419_v37 = vpop.f32.mrf.mxu0  ;;  %v1573_v47 = vmul.f32 %v2805_v23, %v1487_v29 }
 0x35f   : > { %v1607_v39 = vadd.f32 %v1571_v28, %v1570_v22  ;;  %v1489_v40 = vmax.f32 %v1255_v30, 0.0  ;;  %v1259_v41 = vadd.f32 %v1258_v36, %v2783_v1  ;;  %v1491_v43 = vmax.f32 %v1416_v31, 0.0 }
 0x360   : > { %v1638_v42 = vadd.f32 %v1622_v33, %v1569_v32  ;;  %v1420_v44 = vadd.f32 %v1419_v37, %v2785_v2  ;;  %v1260_v45 = vpop.f32.mrf.mxu1  ;;  %v1421_v46 = vpop.f32.mrf.mxu0  ;;  %v1574_v49 = vmul.f32 %v2796_v10, %v1488_v34  ;;  %v1576_v51 = vmul.f32 %v2802_v20, %v1490_v35 }
 0x361   : > { %v1623_v48 = vadd.f32 %v1607_v39, %v1572_v38  ;;  %v1575_v50 = vmul.f32 %v2799_v15, %v1489_v40  ;;  %v1492_v52 = vmax.f32 %v1259_v41, 0.0  ;;  %v1261_v53 = vadd.f32 %v1260_v45, %v2790_v4 }
 0x362   : > { %1654 = vst [vmem:[%s2826_s29 + $0x40] sm:$0xff] %v1638_v42  ;;  %v1422_v54 = vadd.f32 %v1421_v46, %v2792_v5  ;;  %v1264_v55 = vpop.f32.mrf.mxu1  ;;  %v1425_v56 = vpop.f32.mrf.mxu0  ;;  %v1494_v59 = vmax.f32 %v1420_v44, 0.0  ;;  %v1577_v61 = vmul.f32 %v2805_v23, %v1491_v43 }
 0x363   : > { %v1639_v57 = vadd.f32 %v1623_v48, %v1573_v47  ;;  %v1608_v58 = vadd.f32 %v1575_v50, %v1574_v49  ;;  %v1265_v60 = vadd.f32 %v1264_v55, %v2783_v1  ;;  %v1493_v62 = vmax.f32 %v1261_v53, 0.0 }
 0x364   : > { %v1426_v63 = vadd.f32 %v1425_v56, %v2785_v2  ;;  %v1266_v0 = vpop.f32.mrf.mxu1  ;;  %v1427_v3 = vpop.f32.mrf.mxu0  ;;  %v1578_v11 = vmul.f32 %v2796_v10, %v1492_v52  ;;  %v1495_v13 = vmax.f32 %v1422_v54, 0.0  ;;  %v1580_v19 = vmul.f32 %v2802_v20, %v1494_v59 }
 0x365   : > { %1655 = vst [vmem:[%s2826_s29 + $0x48] sm:$0xff] %v1639_v57  ;;  %v1624_v6 = vadd.f32 %v1608_v58, %v1576_v51  ;;  %v1496_v7 = vmax.f32 %v1265_v60, 0.0  ;;  %v1267_v8 = vadd.f32 %v1266_v0, %v2790_v4  ;;  %v1428_v9 = vadd.f32 %v1427_v3, %v2792_v5 }
 0x366   : > { %v1579_v12 = vmul.f32 %v2799_v15, %v1493_v62  ;;  %v1498_v14 = vmax.f32 %v1426_v63, 0.0  ;;  %v1270_v16 = vpop.f32.mrf.mxu1  ;;  %v1431_v17 = vpop.f32.mrf.mxu0  ;;  %v1581_v33 = vmul.f32 %v2805_v23, %v1495_v13 }
 0x367   : > { %v1640_v18 = vadd.f32 %v1624_v6, %v1577_v61  ;;  %v1497_v21 = vmax.f32 %v1267_v8, 0.0  ;;  %v1582_v24 = vmul.f32 %v2796_v10, %v1496_v7  ;;  %v1271_v25 = vadd.f32 %v1270_v16, %v2783_v1 }
 0x368   : > { %v1609_v22 = vadd.f32 %v1579_v12, %v1578_v11  ;;  %v1432_v26 = vadd.f32 %v1431_v17, %v2785_v2  ;;  %v1272_v27 = vpop.f32.mrf.mxu1  ;;  %v1433_v28 = vpop.f32.mrf.mxu0  ;;  %v1499_v30 = vmax.f32 %v1428_v9, 0.0  ;;  %v1584_v35 = vmul.f32 %v2802_v20, %v1498_v14 }
 0x369   : > { %1656 = vst [vmem:[%s2826_s29 + $0x50] sm:$0xff] %v1640_v18  ;;  %v1583_v29 = vmul.f32 %v2799_v15, %v1497_v21  ;;  %v1273_v31 = vadd.f32 %v1272_v27, %v2790_v4  ;;  %v1434_v32 = vadd.f32 %v1433_v28, %v2792_v5  ;;  %v1500_v36 = vmax.f32 %v1271_v25, 0.0 }
 0x36a   : > { %v1625_v34 = vadd.f32 %v1609_v22, %v1580_v19  ;;  %v1276_v37 = vpop.f32.mrf.mxu1  ;;  %v1437_v38 = vpop.f32.mrf.mxu0  ;;  %v1502_v40 = vmax.f32 %v1432_v26, 0.0  ;;  %v1585_v48 = vmul.f32 %v2805_v23, %v1499_v30 }
 0x36b   : > { %v1610_v39 = vadd.f32 %v1583_v29, %v1582_v24  ;;  %v1501_v41 = vmax.f32 %v1273_v31, 0.0  ;;  %v1277_v42 = vadd.f32 %v1276_v37, %v2783_v1  ;;  %v1503_v44 = vmax.f32 %v1434_v32, 0.0 }
 0x36c   : > { %v1641_v43 = vadd.f32 %v1625_v34, %v1581_v33  ;;  %v1438_v45 = vadd.f32 %v1437_v38, %v2785_v2  ;;  %v1278_v46 = vpop.f32.mrf.mxu1  ;;  %v1439_v47 = vpop.f32.mrf.mxu0  ;;  %v1586_v50 = vmul.f32 %v2796_v10, %v1500_v36  ;;  %v1588_v58 = vmul.f32 %v2802_v20, %v1502_v40 }
 0x36d   : > { %v1626_v49 = vadd.f32 %v1610_v39, %v1584_v35  ;;  %v1587_v51 = vmul.f32 %v2799_v15, %v1501_v41  ;;  %v1504_v52 = vmax.f32 %v1277_v42, 0.0  ;;  %v1279_v53 = vadd.f32 %v1278_v46, %v2790_v4 }
 0x36e   : > { %1657 = vst [vmem:[%s2826_s29 + $0x58] sm:$0xff] %v1641_v43  ;;  %v1440_v54 = vadd.f32 %v1439_v47, %v2792_v5  ;;  %v1282_v55 = vpop.f32.mrf.mxu1  ;;  %v1443_v56 = vpop.f32.mrf.mxu0  ;;  %v1589_v61 = vmul.f32 %v2805_v23, %v1503_v44  ;;  %v1506_v62 = vmax.f32 %v1438_v45, 0.0 }
 0x36f   : > { %v1642_v57 = vadd.f32 %v1626_v49, %v1585_v48  ;;  %v1611_v59 = vadd.f32 %v1587_v51, %v1586_v50  ;;  %v1283_v60 = vadd.f32 %v1282_v55, %v2783_v1  ;;  %v1505_v63 = vmax.f32 %v1279_v53, 0.0 }
 0x370   : > { %v1444_v0 = vadd.f32 %v1443_v56, %v2785_v2  ;;  %v1284_v3 = vpop.f32.mrf.mxu1  ;;  %v1445_v6 = vpop.f32.mrf.mxu0  ;;  %v1590_v12 = vmul.f32 %v2796_v10, %v1504_v52  ;;  %v1507_v13 = vmax.f32 %v1440_v54, 0.0  ;;  %v1592_v17 = vmul.f32 %v2802_v20, %v1506_v62 }
 0x371   : > { %1658 = vst [vmem:[%s2826_s29 + $0x60] sm:$0xff] %v1642_v57  ;;  %v1627_v7 = vadd.f32 %v1611_v59, %v1588_v58  ;;  %v1508_v8 = vmax.f32 %v1283_v60, 0.0  ;;  %v1285_v9 = vadd.f32 %v1284_v3, %v2790_v4  ;;  %v1446_v11 = vadd.f32 %v1445_v6, %v2792_v5 }
 0x372   : > { %v1591_v1 = vmul.f32 %v2799_v15, %v1505_v63  ;;  %v1510_v16 = vmax.f32 %v1444_v0, 0.0  ;;  %v1593_v21 = vmul.f32 %v2805_v23, %v1507_v13 }
 0x373   : > { %v1643_v14 = vadd.f32 %v1627_v7, %v1589_v61  ;;  %v1509_v2 = vmax.f32 %v1285_v9, 0.0  ;;  %v1594_v4 = vmul.f32 %v2796_v10, %v1508_v8  ;;  %v1511_v19 = vmax.f32 %v1446_v11, 0.0 }
 0x374   : > { %v1612_v18 = vadd.f32 %v1591_v1, %v1590_v12  ;;  %v1596_v24 = vmul.f32 %v2802_v20, %v1510_v16 }
 0x375   : > { %1659 = vst [vmem:[%s2826_s29 + $0x68] sm:$0xff] %v1643_v14  ;;  %v1595_v5 = vmul.f32 %v2799_v15, %v1509_v2  ;;  %v1597_v27 = vmul.f32 %v2805_v23, %v1511_v19 }
 0x376   : > { %v1628_v22 = vadd.f32 %v1612_v18, %v1592_v17 }
 0x377   : > { %v1613_v25 = vadd.f32 %v1595_v5, %v1594_v4 }
 0x378   : > { %v1644_v26 = vadd.f32 %v1628_v22, %v1593_v21 }
 0x379   : > { %v1629_v28 = vadd.f32 %v1613_v25, %v1596_v24 }
 0x37a   : > { %1660 = vst [vmem:[%s2826_s29 + $0x70] sm:$0xff] %v1644_v26 }
 0x37b   : > { %v1645_v29 = vadd.f32 %v1629_v28, %v1597_v27 }
 0x37d   : > { %1661 = vst [vmem:[%s2826_s29 + $0x78] sm:$0xff] %v1645_v29 }
 0x37e   : > { %2180 = shalt.err (!%p2177_p7)
}
 0x37f   : > { %s2181_s29 = scalar_lea.hbm %s2955_s30, 2048  ;;  %s2185_s1 = scalar_lea.hbm %s3011_s10, 4096 }
 0x380   : > { %p2182_p8 = scmp.ne.s32.totalorder %s2955_s30, %s2181_s29  ;;  %p2186_p11 = scmp.lt.s32.totalorder %s2955_s30, %s3011_s10 }
 0x381   : > { %p2187_p12 = scmp.lt.s32.totalorder %s2185_s1, %s2181_s29 }
 0x382   : > { %p2183_p9 = pnand %p2182_p8, %p2336_p5 }
 0x383   : > { %p2188_p13 = por %p2187_p12, %p2186_p11 }
 0x384   : > { %p2184_p10 = pneg %p2183_p9 }
 0x386   : > { %p2189_p0 = pnand %p2188_p13, %p2184_p10 }
 0x388   : > { %2192 = shalt.err (!%p2189_p0)
}
 0x389   : > { %s3025_s12 = smov 128  }
 0x38a   : > { %2094 = dma.vmem_to_hbm [thread:$0]  (%p2336_p5), %s2957_s22, 2048, %s2955_s30, %s1663_s25, %s3025_s12, %s3025_s12, %s2236_s0  }
 0x38b PF: > { %p2105_p1 = scmp.ge.s32.totalorder %s2231_s20, 2  ;;  %s1712_s14 = sand.u32 1, %s2219_s17  }
 0x38c   : > { %s1713_s21 = scalar_lea.sflag [#allocation3], %s1712_s14 }
 0x38d   : > { %p2099_p2 = pnand %p2105_p1, %p2340_p6 }
 0x38f   : > { %p2100_p3 = pneg %p2099_p2 }
 0x391   : > { %2210 = dma.done.wait (%p2100_p3), %s1713_s21, 2048  }
 0x392   : > { %2212 = vsyncadd (%p2100_p3), %s1713_s21, 4294965248  ;;  %s1722_s29 = scalar_lea.sflag [#allocation5], %s1712_s14 }
 0x393   : > { %2214 = dma.done.wait (%p2100_p3), %s1722_s29, 2048  }
 0x394   : > { %2216 = vsyncadd (%p2100_p3), %s1722_s29, 4294965248  ;;  %p25_p5 = scmp.ge.s32.totalorder %s2323_s23, 4   ;;  %s3026_s17 = smov %s2223_s18 }
 0x395   : > { %s3027_s18 = smov %s2227_s19  ;;  %s3028_s19 = smov %s2334_s26 }
 0x396   : > { %s3029_s20 = smov %s2323_s23  ;;  %27 = sbr.rel (!%p25_p5) target bundleno = 8 (0x8), region = 112 }
 0x39b   :  { %1727 = vsyncpa [#allocation3], 1 }
 0x39c   :  { %1729 = vsyncpa [#allocation3 + $0x1], 1 }
 0x39d   :  { %1730 = vsyncpa [#allocation5], 1 }
 0x39e   :  { %1732 = vsyncpa [#allocation5 + $0x1], 1 }

</bundles_post_ra>
